<compile_context>
chip_gen: v5e
topology: v5e:2x2
jax: 0.10.0
libtpu: 0.0.40
codegen_flags: <defaults>
</compile_context>

<pallas_src>
import jax
import jax.numpy as jnp
from jax import lax
from jax.experimental import pallas as pl
from jax.experimental.pallas import tpu as pltpu

# ---- sizes (small, deterministic) -------------------------------------------
B = 8          # batch
N_IN = 16      # sender_input feature dim (input2hidden = Linear(N_IN, H))
V = 128        # vocab_size
E = 32         # embed_dim
H = 32         # hidden_size (must equal E because of weight tying)
MAX_LEN = 8    # sender max_len
MSG_LEN = 8    # receiver message length
N_OUT = 16     # hidden2output = Linear(H, N_OUT)

VMEM_SPEC = pl.BlockSpec(memory_space=pltpu.MemorySpace.VMEM)

# ---- packed-buffer row offsets (all lane-width-32 tensors in one buffer) -----
# sender pack (S_ROWS, H)
S_WA = 0                 # w_agent           (N_IN, H)
S_WHH = S_WA + N_IN      # w_hh              (H, H)
S_WOH = S_WHH + H        # w_oh2h = WembT@Wih (V, H)
S_BA = S_WOH + V         # b_agent           (1, H)
S_B0 = S_BA + 1          # b_step0 = sos@Wih + b_ih + b_hh
S_BS = S_B0 + 1          # b_step  = b_emb@Wih + b_ih + b_hh
S_ROWS = S_BS + 1        # = 179

# receiver pack (R_ROWS, H)
R_WTOK = 0               # w_tok2h = WembT@Wih_r (V, H)
R_WHH = R_WTOK + V       # w_hh_r            (H, H)
R_WOUT = R_WHH + H       # w_out padded      (H, H), cols [0:N_OUT] valid
R_BRNN = R_WOUT + H      # b_ih_r + b_hh_r   (1, H)
R_BOUT = R_BRNN + 1      # b_out padded      (1, H), cols [0:N_OUT] valid
R_ROWS = R_BOUT + 1      # = 194


# ---- kernels -----------------------------------------------------------------
def sender_kernel(x_ref, w32_ref, wemb_ref, out_ref, acc_ref):
    """RnnSenderGS forward (eval-mode Gumbel-Softmax = one-hot argmax).

    Recurrence uses the folded tied-embedding projection (no concat, no
    embedding matmul on the chain).  One-hots are accumulated time-major in a
    VMEM scratch (dense (8,128) stores) and written batch-first once in the
    epilogue, so no wrapper transpose / extra XLA launch is needed.
    """
    x = x_ref[...]

    # static views into the packed lane-32 buffer
    w_agent = w32_ref[S_WA:S_WA + N_IN, :]        # (N_IN, H)
    w_hh = w32_ref[S_WHH:S_WHH + H, :]            # (H, H)
    w_oh2h = w32_ref[S_WOH:S_WOH + V, :]          # (V, H)   = W_emb.T @ W_ih
    b_agent = jnp.broadcast_to(w32_ref[S_BA:S_BA + 1, :], (B, H))
    b_step0 = jnp.broadcast_to(w32_ref[S_B0:S_B0 + 1, :], (B, H))
    b_step = jnp.broadcast_to(w32_ref[S_BS:S_BS + 1, :], (B, H))
    wemb = wemb_ref[...]                          # (E, V) tied tensor (logits)

    col_v = lax.broadcasted_iota(jnp.int32, (B, V), 1)

    def symbol(h):
        # tied hidden_to_output (TiedLinear); its bias is zero-initialized -> dropped
        logits = jnp.dot(h, wemb, preferred_element_type=jnp.float32)
        # eval-mode gumbel_softmax_sample: one-hot of argmax (exact first-max
        # tie break kept; the (logits == m) multi-hot shortcut changes semantics)
        m = jnp.max(logits, axis=-1, keepdims=True)
        idx = jnp.min(jnp.where(logits == m, col_v, V), axis=-1, keepdims=True)
        return (col_v == idx).astype(jnp.float32)

    # agent / input2hidden: h0 = x @ Wa + ba
    h = jnp.dot(x, w_agent, preferred_element_type=jnp.float32) + b_agent

    # step 0: e0 = sos, folded into b_step0  ->  h = tanh(h @ Whh + b_step0)
    h = jnp.tanh(jnp.dot(h, w_hh, preferred_element_type=jnp.float32) + b_step0)
    onehot = symbol(h)
    acc_ref[0, :, :] = onehot

    # steps 1..MAX_LEN-1: h = tanh(onehot @ W_oh2h + h @ Whh + b_step)
    for t in range(1, MAX_LEN):
        h = jnp.tanh(jnp.dot(onehot, w_oh2h, preferred_element_type=jnp.float32)
                     + jnp.dot(h, w_hh, preferred_element_type=jnp.float32)
                     + b_step)
        onehot = symbol(h)
        acc_ref[t, :, :] = onehot

    # append EOS symbol (one-hot at index 0)
    acc_ref[MAX_LEN, :, :] = (col_v == 0).astype(jnp.float32)

    # epilogue: batch-first writeback (off the recurrence critical path)
    for t in range(MAX_LEN + 1):
        out_ref[:, t, :] = acc_ref[t, :, :]


def receiver_kernel(msg_ref, w32_ref, out_ref):
    """RnnEncoder (TiedEmbedding + packed nn.RNN) followed by hidden2output."""
    msg = msg_ref[...]  # (B, L) int32

    # find_lengths: position of first 0 token + 1, clamped to L
    pos = lax.broadcasted_iota(jnp.int32, (B, MSG_LEN), 1)
    first_zero = jnp.min(jnp.where(msg == 0, pos, MSG_LEN), axis=1, keepdims=True)
    lengths = jnp.minimum(first_zero + 1, MSG_LEN)  # (B, 1)

    # static views into the packed lane-32 buffer
    w_tok2h = w32_ref[R_WTOK:R_WTOK + V, :]                     # (V, H) folded
    w_hh_r = w32_ref[R_WHH:R_WHH + H, :]                        # (H, H)
    w_out = w32_ref[R_WOUT:R_WOUT + H, 0:N_OUT]                 # (H, N_OUT)
    b_rnn = jnp.broadcast_to(w32_ref[R_BRNN:R_BRNN + 1, :], (MSG_LEN * B, H))
    b_out = jnp.broadcast_to(w32_ref[R_BOUT:R_BOUT + 1, 0:N_OUT], (B, N_OUT))

    # Hoisted off the serial chain: build time-major one-hots in-kernel (no
    # msg_flat host plumbing) and project ALL L tokens with one MXU pass.
    # Row (t * B + b) corresponds to token msg[b, t].
    col_v = lax.broadcasted_iota(jnp.int32, (B, V), 1)
    onehots = jnp.concatenate(
        [(col_v == msg[:, t:t + 1]).astype(jnp.float32) for t in range(MSG_LEN)],
        axis=0)                                                 # (L*B, V)
    proj = jnp.dot(onehots, w_tok2h, preferred_element_type=jnp.float32) + b_rnn

    h = jnp.zeros((B, H), dtype=jnp.float32)
    for t in range(MSG_LEN):
        pre = proj[t * B:(t + 1) * B, :]            # (B, H) static, sublane-aligned
        h_new = jnp.tanh(pre + jnp.dot(h, w_hh_r, preferred_element_type=jnp.float32))
        # packed-sequence semantics: hidden stops updating once t >= length
        h = jnp.where(t < lengths, h_new, h)

    out_ref[...] = (jnp.dot(h, w_out, preferred_element_type=jnp.float32)
                    + b_out).astype(out_ref.dtype)


# ---- wrapper -----------------------------------------------------------------
def tied_rnn_gs_forward(params, sender_input=None, message=None):
    """Mirrors TiedRnnGS.forward: receiver branch if message given, else sender."""
    if message is not None:
        return pl.pallas_call(
            receiver_kernel,
            out_shape=jax.ShapeDtypeStruct((B, N_OUT), jnp.float32),
            in_specs=[VMEM_SPEC] * 2,
            out_specs=VMEM_SPEC,
        )(message, params["w_recv_pack"])

    assert sender_input is not None
    return pl.pallas_call(
        sender_kernel,
        out_shape=jax.ShapeDtypeStruct((B, MAX_LEN + 1, V), jnp.float32),
        in_specs=[VMEM_SPEC] * 3,
        out_specs=VMEM_SPEC,
        scratch_shapes=[pltpu.VMEM((MAX_LEN + 1, B, V), jnp.float32)],
    )(sender_input, params["w_sender_pack"], params["w_emb"])


# ---- deterministic parameter init (shapes follow the PyTorch module) ---------
def init_params(key):
    ks = jax.random.split(key, 14)

    def u(k, shape, scale=0.2):
        return jax.random.uniform(k, shape, jnp.float32, -scale, scale)

    # sender.embedding = nn.Linear(V, E): weight (E, V) -- the tied tensor
    w_emb = u(ks[0], (E, V))
    p = dict(
        # input2hidden (assumed Linear(N_IN, H)), stored transposed
        w_agent=u(ks[1], (N_IN, H)), b_agent=u(ks[2], (1, H)),
        sos=jnp.zeros((1, E), jnp.float32),            # sos_embedding init = zeros
        # sender nn.RNNCell (transposed)
        w_ih=u(ks[3], (E, H)), b_ih=u(ks[4], (1, H)),
        w_hh=u(ks[5], (H, H)), b_hh=u(ks[6], (1, H)),
        # tied embedding / TiedLinear
        w_emb=w_emb, w_emb_T=w_emb.T, b_emb=u(ks[7], (1, E)),
        b_h2o=jnp.zeros((1, V), jnp.float32),          # TiedLinear bias init = zeros
        # receiver nn.RNN layer 0 (separate, untied) (transposed)
        w_ih_r=u(ks[8], (E, H)), b_ih_r=u(ks[9], (1, H)),
        w_hh_r=u(ks[10], (H, H)), b_hh_r=u(ks[11], (1, H)),
        # hidden2output (assumed Linear(H, N_OUT)), stored transposed
        w_out=u(ks[12], (H, N_OUT)), b_out=u(ks[13], (1, N_OUT)),
    )

    # ---- folded + packed kernel buffers ------------------------------------
    # sender: fold tied embedding into the recurrent input projection
    w_oh2h = p["w_emb_T"] @ p["w_ih"]                               # (V, H)
    b_step0 = p["sos"] @ p["w_ih"] + p["b_ih"] + p["b_hh"]          # (1, H)
    b_step = p["b_emb"] @ p["w_ih"] + p["b_ih"] + p["b_hh"]         # (1, H)
    p["w_sender_pack"] = jnp.concatenate(
        [p["w_agent"], p["w_hh"], w_oh2h, p["b_agent"], b_step0, b_step],
        axis=0)                                                     # (S_ROWS, H)
    assert p["w_sender_pack"].shape == (S_ROWS, H)

    # receiver: fold tied embedding into the RNN input projection
    w_tok2h = p["w_emb_T"] @ p["w_ih_r"]                            # (V, H)
    b_rnn = p["b_ih_r"] + p["b_hh_r"]                               # (1, H)
    w_out_pad = jnp.zeros((H, H), jnp.float32).at[:, :N_OUT].set(p["w_out"])
    b_out_pad = jnp.zeros((1, H), jnp.float32).at[:, :N_OUT].set(p["b_out"])
    p["w_recv_pack"] = jnp.concatenate(
        [w_tok2h, p["w_hh_r"], w_out_pad, b_rnn, b_out_pad], axis=0)  # (R_ROWS, H)
    assert p["w_recv_pack"].shape == (R_ROWS, H)
    return p


# ---- pure-JAX references for verification (mirror the PyTorch module) --------
def sender_ref(params, x):
    h = x @ params["w_agent"] + params["b_agent"]
    e = jnp.broadcast_to(params["sos"], (B, E))
    seq = []
    for _ in range(MAX_LEN):
        h = jnp.tanh(e @ params["w_ih"] + params["b_ih"]
                     + h @ params["w_hh"] + params["b_hh"])
        logits = h @ params["w_emb"] + params["b_h2o"]
        onehot = jax.nn.one_hot(jnp.argmax(logits, -1), V, dtype=jnp.float32)
        seq.append(onehot)
        e = onehot @ params["w_emb_T"] + params["b_emb"]
    seq.append(jax.nn.one_hot(jnp.zeros((B,), jnp.int32), V, dtype=jnp.float32))
    return jnp.stack(seq, axis=1)


def receiver_ref(params, msg):
    L = msg.shape[1]
    first_zero = jnp.min(jnp.where(msg == 0, jnp.arange(L)[None, :], L), axis=1)
    lengths = jnp.minimum(first_zero + 1, L)[:, None]
    table = params["w_emb_T"]  # (V, E)
    h = jnp.zeros((B, H), jnp.float32)
    for t in range(L):
        e = table[msg[:, t]]
        h_new = jnp.tanh(e @ params["w_ih_r"] + params["b_ih_r"]
                         + h @ params["w_hh_r"] + params["b_hh_r"])
        h = jnp.where(t < lengths, h_new, h)
    return h @ params["w_out"] + params["b_out"]


if __name__ == "__main__":
    key = jax.random.PRNGKey(0)
    kp, kx, km = jax.random.split(key, 3)
    params = init_params(kp)

    sender_input = jax.random.normal(kx, (B, N_IN), dtype=jnp.float32)
    message = jax.random.randint(km, (B, MSG_LEN), 0, V, dtype=jnp.int32)

    # sender branch (message is None)
    seq = jax.block_until_ready(tied_rnn_gs_forward(params, sender_input=sender_input))
    # receiver branch (message given)
    out = jax.block_until_ready(tied_rnn_gs_forward(params, message=message))

    assert seq.shape == (B, MAX_LEN + 1, V) and out.shape == (B, N_OUT)
    seq_r = sender_ref(params, sender_input)
    out_r = receiver_ref(params, message)
    assert jnp.allclose(seq, seq_r, atol=1e-5), "sender branch mismatch"
    assert jnp.allclose(out, out_r, atol=1e-4), "receiver branch mismatch"

    print("KERNEL_OK")
</pallas_src>

<mosaic_0001>
module attributes {stable_mosaic.version = 11 : i64} {
  func.func @sender_kernel(%arg0: memref<8x16xf32, #tpu.memory_space<vmem>>, %arg1: memref<179x32xf32, #tpu.memory_space<vmem>>, %arg2: memref<32x128xf32, #tpu.memory_space<vmem>>, %arg3: memref<8x9x128xf32, #tpu.memory_space<vmem>>, %arg4: memref<9x8x128xf32, #tpu.memory_space<vmem>>) attributes {dimension_semantics = [], scalar_prefetch = 0 : i64, scratch_operands = 1 : i64, tpu.core_type = #tpu.core_type<tc>} {
    %c0 = arith.constant 0 : index
    %c0_0 = arith.constant 0 : index
    %0 = vector.load %arg0[%c0, %c0_0] : memref<8x16xf32, #tpu.memory_space<vmem>>, vector<8x16xf32>
    %c0_1 = arith.constant 0 : index
    %c0_2 = arith.constant 0 : index
    %1 = vector.load %arg1[%c0_1, %c0_2] : memref<179x32xf32, #tpu.memory_space<vmem>>, vector<16x32xf32>
    %c16 = arith.constant 16 : index
    %c0_3 = arith.constant 0 : index
    %2 = vector.load %arg1[%c16, %c0_3] : memref<179x32xf32, #tpu.memory_space<vmem>>, vector<32x32xf32>
    %c48 = arith.constant 48 : index
    %c0_4 = arith.constant 0 : index
    %3 = vector.load %arg1[%c48, %c0_4] : memref<179x32xf32, #tpu.memory_space<vmem>>, vector<128x32xf32>
    %c176 = arith.constant 176 : index
    %c0_5 = arith.constant 0 : index
    %4 = vector.load %arg1[%c176, %c0_5] : memref<179x32xf32, #tpu.memory_space<vmem>>, vector<1x32xf32>
    %5 = vector.shape_cast %4 : vector<1x32xf32> to vector<1x32xf32>
    %6 = vector.broadcast %5 : vector<1x32xf32> to vector<8x32xf32>
    %c177 = arith.constant 177 : index
    %c0_6 = arith.constant 0 : index
    %7 = vector.load %arg1[%c177, %c0_6] : memref<179x32xf32, #tpu.memory_space<vmem>>, vector<1x32xf32>
    %8 = vector.shape_cast %7 : vector<1x32xf32> to vector<1x32xf32>
    %9 = vector.broadcast %8 : vector<1x32xf32> to vector<8x32xf32>
    %c178 = arith.constant 178 : index
    %c0_7 = arith.constant 0 : index
    %10 = vector.load %arg1[%c178, %c0_7] : memref<179x32xf32, #tpu.memory_space<vmem>>, vector<1x32xf32>
    %11 = vector.shape_cast %10 : vector<1x32xf32> to vector<1x32xf32>
    %12 = vector.broadcast %11 : vector<1x32xf32> to vector<8x32xf32>
    %c0_8 = arith.constant 0 : index
    %c0_9 = arith.constant 0 : index
    %13 = vector.load %arg2[%c0_8, %c0_9] : memref<32x128xf32, #tpu.memory_space<vmem>>, vector<32x128xf32>
    %14 = tpu.iota {dimensions = array<i32: 1>} : vector<8x128xi32>
    %cst = arith.constant dense<0.000000e+00> : vector<8x32xf32>
    %15 = tpu.matmul %0, %1, %cst {dimension_numbers = #tpu.dot_dimension_numbers<[1], [0], [0], [1], [0, 0, 1, 1], [], []>} : vector<8x16xf32>, vector<16x32xf32>, vector<8x32xf32> -> vector<8x32xf32>
    %16 = arith.addf %15, %6 : vector<8x32xf32>
    %cst_10 = arith.constant dense<0.000000e+00> : vector<8x32xf32>
    %17 = tpu.matmul %16, %2, %cst_10 {dimension_numbers = #tpu.dot_dimension_numbers<[1], [0], [0], [1], [0, 0, 1, 1], [], []>} : vector<8x32xf32>, vector<32x32xf32>, vector<8x32xf32> -> vector<8x32xf32>
    %18 = arith.addf %17, %9 : vector<8x32xf32>
    %19 = math.tanh %18 : vector<8x32xf32>
    %cst_11 = arith.constant dense<0.000000e+00> : vector<8x128xf32>
    %20 = tpu.matmul %19, %13, %cst_11 {dimension_numbers = #tpu.dot_dimension_numbers<[1], [0], [0], [1], [0, 0, 1, 1], [], []>} : vector<8x32xf32>, vector<32x128xf32>, vector<8x128xf32> -> vector<8x128xf32>
    %cst_12 = arith.constant dense<0xFF800000> : vector<8xf32>
    %21 = vector.multi_reduction <maximumf>, %20, %cst_12 [1] : vector<8x128xf32> to vector<8xf32>
    %22 = vector.shape_cast %21 : vector<8xf32> to vector<8x1xf32>
    %23 = vector.broadcast %22 : vector<8x1xf32> to vector<8x128xf32>
    %24 = arith.cmpf oeq, %20, %23 : vector<8x128xf32>
    %c128_i32 = arith.constant 128 : i32
    %25 = vector.broadcast %c128_i32 : i32 to vector<8x128xi32>
    %26 = arith.select %24, %14, %25 : vector<8x128xi1>, vector<8x128xi32>
    %cst_13 = arith.constant dense<2147483647> : vector<8xi32>
    %27 = vector.multi_reduction <minsi>, %26, %cst_13 [1] : vector<8x128xi32> to vector<8xi32>
    %28 = vector.shape_cast %27 : vector<8xi32> to vector<8x1xi32>
    %29 = vector.broadcast %28 : vector<8x1xi32> to vector<8x128xi32>
    %30 = arith.cmpi eq, %14, %29 : vector<8x128xi32>
    %31 = arith.extui %30 : vector<8x128xi1> to vector<8x128xi32>
    %32 = arith.sitofp %31 : vector<8x128xi32> to vector<8x128xf32>
    %c0_14 = arith.constant 0 : index
    %c0_15 = arith.constant 0 : index
    %c0_16 = arith.constant 0 : index
    %33 = vector.load %arg4[%c0_14, %c0_15, %c0_16] : memref<9x8x128xf32, #tpu.memory_space<vmem>>, vector<1x8x128xf32>
    %34 = vector.shape_cast %33 : vector<1x8x128xf32> to vector<8x128xf32>
    %35 = vector.shape_cast %32 : vector<8x128xf32> to vector<1x8x128xf32>
    tpu.vector_store %arg4[%c0_14, %c0_15, %c0_16], %35 {strides = array<i32>} : memref<9x8x128xf32, #tpu.memory_space<vmem>>, vector<1x8x128xf32>,
    %cst_17 = arith.constant dense<0.000000e+00> : vector<8x32xf32>
    %36 = tpu.matmul %32, %3, %cst_17 {dimension_numbers = #tpu.dot_dimension_numbers<[1], [0], [0], [1], [0, 0, 1, 1], [], []>} : vector<8x128xf32>, vector<128x32xf32>, vector<8x32xf32> -> vector<8x32xf32>
    %cst_18 = arith.constant dense<0.000000e+00> : vector<8x32xf32>
    %37 = tpu.matmul %19, %2, %cst_18 {dimension_numbers = #tpu.dot_dimension_numbers<[1], [0], [0], [1], [0, 0, 1, 1], [], []>} : vector<8x32xf32>, vector<32x32xf32>, vector<8x32xf32> -> vector<8x32xf32>
    %38 = arith.addf %36, %37 : vector<8x32xf32>
    %39 = arith.addf %38, %12 : vector<8x32xf32>
    %40 = math.tanh %39 : vector<8x32xf32>
    %cst_19 = arith.constant dense<0.000000e+00> : vector<8x128xf32>
    %41 = tpu.matmul %40, %13, %cst_19 {dimension_numbers = #tpu.dot_dimension_numbers<[1], [0], [0], [1], [0, 0, 1, 1], [], []>} : vector<8x32xf32>, vector<32x128xf32>, vector<8x128xf32> -> vector<8x128xf32>
    %cst_20 = arith.constant dense<0xFF800000> : vector<8xf32>
    %42 = vector.multi_reduction <maximumf>, %41, %cst_20 [1] : vector<8x128xf32> to vector<8xf32>
    %43 = vector.shape_cast %42 : vector<8xf32> to vector<8x1xf32>
    %44 = vector.broadcast %43 : vector<8x1xf32> to vector<8x128xf32>
    %45 = arith.cmpf oeq, %41, %44 : vector<8x128xf32>
    %c128_i32_21 = arith.constant 128 : i32
    %46 = vector.broadcast %c128_i32_21 : i32 to vector<8x128xi32>
    %47 = arith.select %45, %14, %46 : vector<8x128xi1>, vector<8x128xi32>
    %cst_22 = arith.constant dense<2147483647> : vector<8xi32>
    %48 = vector.multi_reduction <minsi>, %47, %cst_22 [1] : vector<8x128xi32> to vector<8xi32>
    %49 = vector.shape_cast %48 : vector<8xi32> to vector<8x1xi32>
    %50 = vector.broadcast %49 : vector<8x1xi32> to vector<8x128xi32>
    %51 = arith.cmpi eq, %14, %50 : vector<8x128xi32>
    %52 = arith.extui %51 : vector<8x128xi1> to vector<8x128xi32>
    %53 = arith.sitofp %52 : vector<8x128xi32> to vector<8x128xf32>
    %c1 = arith.constant 1 : index
    %c0_23 = arith.constant 0 : index
    %c0_24 = arith.constant 0 : index
    %54 = vector.load %arg4[%c1, %c0_23, %c0_24] : memref<9x8x128xf32, #tpu.memory_space<vmem>>, vector<1x8x128xf32>
    %55 = vector.shape_cast %54 : vector<1x8x128xf32> to vector<8x128xf32>
    %56 = vector.shape_cast %53 : vector<8x128xf32> to vector<1x8x128xf32>
    tpu.vector_store %arg4[%c1, %c0_23, %c0_24], %56 {strides = array<i32>} : memref<9x8x128xf32, #tpu.memory_space<vmem>>, vector<1x8x128xf32>,
    %cst_25 = arith.constant dense<0.000000e+00> : vector<8x32xf32>
    %57 = tpu.matmul %53, %3, %cst_25 {dimension_numbers = #tpu.dot_dimension_numbers<[1], [0], [0], [1], [0, 0, 1, 1], [], []>} : vector<8x128xf32>, vector<128x32xf32>, vector<8x32xf32> -> vector<8x32xf32>
    %cst_26 = arith.constant dense<0.000000e+00> : vector<8x32xf32>
    %58 = tpu.matmul %40, %2, %cst_26 {dimension_numbers = #tpu.dot_dimension_numbers<[1], [0], [0], [1], [0, 0, 1, 1], [], []>} : vector<8x32xf32>, vector<32x32xf32>, vector<8x32xf32> -> vector<8x32xf32>
    %59 = arith.addf %57, %58 : vector<8x32xf32>
    %60 = arith.addf %59, %12 : vector<8x32xf32>
    %61 = math.tanh %60 : vector<8x32xf32>
    %cst_27 = arith.constant dense<0.000000e+00> : vector<8x128xf32>
    %62 = tpu.matmul %61, %13, %cst_27 {dimension_numbers = #tpu.dot_dimension_numbers<[1], [0], [0], [1], [0, 0, 1, 1], [], []>} : vector<8x32xf32>, vector<32x128xf32>, vector<8x128xf32> -> vector<8x128xf32>
    %cst_28 = arith.constant dense<0xFF800000> : vector<8xf32>
    %63 = vector.multi_reduction <maximumf>, %62, %cst_28 [1] : vector<8x128xf32> to vector<8xf32>
    %64 = vector.shape_cast %63 : vector<8xf32> to vector<8x1xf32>
    %65 = vector.broadcast %64 : vector<8x1xf32> to vector<8x128xf32>
    %66 = arith.cmpf oeq, %62, %65 : vector<8x128xf32>
    %c128_i32_29 = arith.constant 128 : i32
    %67 = vector.broadcast %c128_i32_29 : i32 to vector<8x128xi32>
    %68 = arith.select %66, %14, %67 : vector<8x128xi1>, vector<8x128xi32>
    %cst_30 = arith.constant dense<2147483647> : vector<8xi32>
    %69 = vector.multi_reduction <minsi>, %68, %cst_30 [1] : vector<8x128xi32> to vector<8xi32>
    %70 = vector.shape_cast %69 : vector<8xi32> to vector<8x1xi32>
    %71 = vector.broadcast %70 : vector<8x1xi32> to vector<8x128xi32>
    %72 = arith.cmpi eq, %14, %71 : vector<8x128xi32>
    %73 = arith.extui %72 : vector<8x128xi1> to vector<8x128xi32>
    %74 = arith.sitofp %73 : vector<8x128xi32> to vector<8x128xf32>
    %c2 = arith.constant 2 : index
    %c0_31 = arith.constant 0 : index
    %c0_32 = arith.constant 0 : index
    %75 = vector.load %arg4[%c2, %c0_31, %c0_32] : memref<9x8x128xf32, #tpu.memory_space<vmem>>, vector<1x8x128xf32>
    %76 = vector.shape_cast %75 : vector<1x8x128xf32> to vector<8x128xf32>
    %77 = vector.shape_cast %74 : vector<8x128xf32> to vector<1x8x128xf32>
    tpu.vector_store %arg4[%c2, %c0_31, %c0_32], %77 {strides = array<i32>} : memref<9x8x128xf32, #tpu.memory_space<vmem>>, vector<1x8x128xf32>,
    %cst_33 = arith.constant dense<0.000000e+00> : vector<8x32xf32>
    %78 = tpu.matmul %74, %3, %cst_33 {dimension_numbers = #tpu.dot_dimension_numbers<[1], [0], [0], [1], [0, 0, 1, 1], [], []>} : vector<8x128xf32>, vector<128x32xf32>, vector<8x32xf32> -> vector<8x32xf32>
    %cst_34 = arith.constant dense<0.000000e+00> : vector<8x32xf32>
    %79 = tpu.matmul %61, %2, %cst_34 {dimension_numbers = #tpu.dot_dimension_numbers<[1], [0], [0], [1], [0, 0, 1, 1], [], []>} : vector<8x32xf32>, vector<32x32xf32>, vector<8x32xf32> -> vector<8x32xf32>
    %80 = arith.addf %78, %79 : vector<8x32xf32>
    %81 = arith.addf %80, %12 : vector<8x32xf32>
    %82 = math.tanh %81 : vector<8x32xf32>
    %cst_35 = arith.constant dense<0.000000e+00> : vector<8x128xf32>
    %83 = tpu.matmul %82, %13, %cst_35 {dimension_numbers = #tpu.dot_dimension_numbers<[1], [0], [0], [1], [0, 0, 1, 1], [], []>} : vector<8x32xf32>, vector<32x128xf32>, vector<8x128xf32> -> vector<8x128xf32>
    %cst_36 = arith.constant dense<0xFF800000> : vector<8xf32>
    %84 = vector.multi_reduction <maximumf>, %83, %cst_36 [1] : vector<8x128xf32> to vector<8xf32>
    %85 = vector.shape_cast %84 : vector<8xf32> to vector<8x1xf32>
    %86 = vector.broadcast %85 : vector<8x1xf32> to vector<8x128xf32>
    %87 = arith.cmpf oeq, %83, %86 : vector<8x128xf32>
    %c128_i32_37 = arith.constant 128 : i32
    %88 = vector.broadcast %c128_i32_37 : i32 to vector<8x128xi32>
    %89 = arith.select %87, %14, %88 : vector<8x128xi1>, vector<8x128xi32>
    %cst_38 = arith.constant dense<2147483647> : vector<8xi32>
    %90 = vector.multi_reduction <minsi>, %89, %cst_38 [1] : vector<8x128xi32> to vector<8xi32>
    %91 = vector.shape_cast %90 : vector<8xi32> to vector<8x1xi32>
    %92 = vector.broadcast %91 : vector<8x1xi32> to vector<8x128xi32>
    %93 = arith.cmpi eq, %14, %92 : vector<8x128xi32>
    %94 = arith.extui %93 : vector<8x128xi1> to vector<8x128xi32>
    %95 = arith.sitofp %94 : vector<8x128xi32> to vector<8x128xf32>
    %c3 = arith.constant 3 : index
    %c0_39 = arith.constant 0 : index
    %c0_40 = arith.constant 0 : index
    %96 = vector.load %arg4[%c3, %c0_39, %c0_40] : memref<9x8x128xf32, #tpu.memory_space<vmem>>, vector<1x8x128xf32>
    %97 = vector.shape_cast %96 : vector<1x8x128xf32> to vector<8x128xf32>
    %98 = vector.shape_cast %95 : vector<8x128xf32> to vector<1x8x128xf32>
    tpu.vector_store %arg4[%c3, %c0_39, %c0_40], %98 {strides = array<i32>} : memref<9x8x128xf32, #tpu.memory_space<vmem>>, vector<1x8x128xf32>,
    %cst_41 = arith.constant dense<0.000000e+00> : vector<8x32xf32>
    %99 = tpu.matmul %95, %3, %cst_41 {dimension_numbers = #tpu.dot_dimension_numbers<[1], [0], [0], [1], [0, 0, 1, 1], [], []>} : vector<8x128xf32>, vector<128x32xf32>, vector<8x32xf32> -> vector<8x32xf32>
    %cst_42 = arith.constant dense<0.000000e+00> : vector<8x32xf32>
    %100 = tpu.matmul %82, %2, %cst_42 {dimension_numbers = #tpu.dot_dimension_numbers<[1], [0], [0], [1], [0, 0, 1, 1], [], []>} : vector<8x32xf32>, vector<32x32xf32>, vector<8x32xf32> -> vector<8x32xf32>
    %101 = arith.addf %99, %100 : vector<8x32xf32>
    %102 = arith.addf %101, %12 : vector<8x32xf32>
    %103 = math.tanh %102 : vector<8x32xf32>
    %cst_43 = arith.constant dense<0.000000e+00> : vector<8x128xf32>
    %104 = tpu.matmul %103, %13, %cst_43 {dimension_numbers = #tpu.dot_dimension_numbers<[1], [0], [0], [1], [0, 0, 1, 1], [], []>} : vector<8x32xf32>, vector<32x128xf32>, vector<8x128xf32> -> vector<8x128xf32>
    %cst_44 = arith.constant dense<0xFF800000> : vector<8xf32>
    %105 = vector.multi_reduction <maximumf>, %104, %cst_44 [1] : vector<8x128xf32> to vector<8xf32>
    %106 = vector.shape_cast %105 : vector<8xf32> to vector<8x1xf32>
    %107 = vector.broadcast %106 : vector<8x1xf32> to vector<8x128xf32>
    %108 = arith.cmpf oeq, %104, %107 : vector<8x128xf32>
    %c128_i32_45 = arith.constant 128 : i32
    %109 = vector.broadcast %c128_i32_45 : i32 to vector<8x128xi32>
    %110 = arith.select %108, %14, %109 : vector<8x128xi1>, vector<8x128xi32>
    %cst_46 = arith.constant dense<2147483647> : vector<8xi32>
    %111 = vector.multi_reduction <minsi>, %110, %cst_46 [1] : vector<8x128xi32> to vector<8xi32>
    %112 = vector.shape_cast %111 : vector<8xi32> to vector<8x1xi32>
    %113 = vector.broadcast %112 : vector<8x1xi32> to vector<8x128xi32>
    %114 = arith.cmpi eq, %14, %113 : vector<8x128xi32>
    %115 = arith.extui %114 : vector<8x128xi1> to vector<8x128xi32>
    %116 = arith.sitofp %115 : vector<8x128xi32> to vector<8x128xf32>
    %c4 = arith.constant 4 : index
    %c0_47 = arith.constant 0 : index
    %c0_48 = arith.constant 0 : index
    %117 = vector.load %arg4[%c4, %c0_47, %c0_48] : memref<9x8x128xf32, #tpu.memory_space<vmem>>, vector<1x8x128xf32>
    %118 = vector.shape_cast %117 : vector<1x8x128xf32> to vector<8x128xf32>
    %119 = vector.shape_cast %116 : vector<8x128xf32> to vector<1x8x128xf32>
    tpu.vector_store %arg4[%c4, %c0_47, %c0_48], %119 {strides = array<i32>} : memref<9x8x128xf32, #tpu.memory_space<vmem>>, vector<1x8x128xf32>,
    %cst_49 = arith.constant dense<0.000000e+00> : vector<8x32xf32>
    %120 = tpu.matmul %116, %3, %cst_49 {dimension_numbers = #tpu.dot_dimension_numbers<[1], [0], [0], [1], [0, 0, 1, 1], [], []>} : vector<8x128xf32>, vector<128x32xf32>, vector<8x32xf32> -> vector<8x32xf32>
    %cst_50 = arith.constant dense<0.000000e+00> : vector<8x32xf32>
    %121 = tpu.matmul %103, %2, %cst_50 {dimension_numbers = #tpu.dot_dimension_numbers<[1], [0], [0], [1], [0, 0, 1, 1], [], []>} : vector<8x32xf32>, vector<32x32xf32>, vector<8x32xf32> -> vector<8x32xf32>
    %122 = arith.addf %120, %121 : vector<8x32xf32>
    %123 = arith.addf %122, %12 : vector<8x32xf32>
    %124 = math.tanh %123 : vector<8x32xf32>
    %cst_51 = arith.constant dense<0.000000e+00> : vector<8x128xf32>
    %125 = tpu.matmul %124, %13, %cst_51 {dimension_numbers = #tpu.dot_dimension_numbers<[1], [0], [0], [1], [0, 0, 1, 1], [], []>} : vector<8x32xf32>, vector<32x128xf32>, vector<8x128xf32> -> vector<8x128xf32>
    %cst_52 = arith.constant dense<0xFF800000> : vector<8xf32>
    %126 = vector.multi_reduction <maximumf>, %125, %cst_52 [1] : vector<8x128xf32> to vector<8xf32>
    %127 = vector.shape_cast %126 : vector<8xf32> to vector<8x1xf32>
    %128 = vector.broadcast %127 : vector<8x1xf32> to vector<8x128xf32>
    %129 = arith.cmpf oeq, %125, %128 : vector<8x128xf32>
    %c128_i32_53 = arith.constant 128 : i32
    %130 = vector.broadcast %c128_i32_53 : i32 to vector<8x128xi32>
    %131 = arith.select %129, %14, %130 : vector<8x128xi1>, vector<8x128xi32>
    %cst_54 = arith.constant dense<2147483647> : vector<8xi32>
    %132 = vector.multi_reduction <minsi>, %131, %cst_54 [1] : vector<8x128xi32> to vector<8xi32>
    %133 = vector.shape_cast %132 : vector<8xi32> to vector<8x1xi32>
    %134 = vector.broadcast %133 : vector<8x1xi32> to vector<8x128xi32>
    %135 = arith.cmpi eq, %14, %134 : vector<8x128xi32>
    %136 = arith.extui %135 : vector<8x128xi1> to vector<8x128xi32>
    %137 = arith.sitofp %136 : vector<8x128xi32> to vector<8x128xf32>
    %c5 = arith.constant 5 : index
    %c0_55 = arith.constant 0 : index
    %c0_56 = arith.constant 0 : index
    %138 = vector.load %arg4[%c5, %c0_55, %c0_56] : memref<9x8x128xf32, #tpu.memory_space<vmem>>, vector<1x8x128xf32>
    %139 = vector.shape_cast %138 : vector<1x8x128xf32> to vector<8x128xf32>
    %140 = vector.shape_cast %137 : vector<8x128xf32> to vector<1x8x128xf32>
    tpu.vector_store %arg4[%c5, %c0_55, %c0_56], %140 {strides = array<i32>} : memref<9x8x128xf32, #tpu.memory_space<vmem>>, vector<1x8x128xf32>,
    %cst_57 = arith.constant dense<0.000000e+00> : vector<8x32xf32>
    %141 = tpu.matmul %137, %3, %cst_57 {dimension_numbers = #tpu.dot_dimension_numbers<[1], [0], [0], [1], [0, 0, 1, 1], [], []>} : vector<8x128xf32>, vector<128x32xf32>, vector<8x32xf32> -> vector<8x32xf32>
    %cst_58 = arith.constant dense<0.000000e+00> : vector<8x32xf32>
    %142 = tpu.matmul %124, %2, %cst_58 {dimension_numbers = #tpu.dot_dimension_numbers<[1], [0], [0], [1], [0, 0, 1, 1], [], []>} : vector<8x32xf32>, vector<32x32xf32>, vector<8x32xf32> -> vector<8x32xf32>
    %143 = arith.addf %141, %142 : vector<8x32xf32>
    %144 = arith.addf %143, %12 : vector<8x32xf32>
    %145 = math.tanh %144 : vector<8x32xf32>
    %cst_59 = arith.constant dense<0.000000e+00> : vector<8x128xf32>
    %146 = tpu.matmul %145, %13, %cst_59 {dimension_numbers = #tpu.dot_dimension_numbers<[1], [0], [0], [1], [0, 0, 1, 1], [], []>} : vector<8x32xf32>, vector<32x128xf32>, vector<8x128xf32> -> vector<8x128xf32>
    %cst_60 = arith.constant dense<0xFF800000> : vector<8xf32>
    %147 = vector.multi_reduction <maximumf>, %146, %cst_60 [1] : vector<8x128xf32> to vector<8xf32>
    %148 = vector.shape_cast %147 : vector<8xf32> to vector<8x1xf32>
    %149 = vector.broadcast %148 : vector<8x1xf32> to vector<8x128xf32>
    %150 = arith.cmpf oeq, %146, %149 : vector<8x128xf32>
    %c128_i32_61 = arith.constant 128 : i32
    %151 = vector.broadcast %c128_i32_61 : i32 to vector<8x128xi32>
    %152 = arith.select %150, %14, %151 : vector<8x128xi1>, vector<8x128xi32>
    %cst_62 = arith.constant dense<2147483647> : vector<8xi32>
    %153 = vector.multi_reduction <minsi>, %152, %cst_62 [1] : vector<8x128xi32> to vector<8xi32>
    %154 = vector.shape_cast %153 : vector<8xi32> to vector<8x1xi32>
    %155 = vector.broadcast %154 : vector<8x1xi32> to vector<8x128xi32>
    %156 = arith.cmpi eq, %14, %155 : vector<8x128xi32>
    %157 = arith.extui %156 : vector<8x128xi1> to vector<8x128xi32>
    %158 = arith.sitofp %157 : vector<8x128xi32> to vector<8x128xf32>
    %c6 = arith.constant 6 : index
    %c0_63 = arith.constant 0 : index
    %c0_64 = arith.constant 0 : index
    %159 = vector.load %arg4[%c6, %c0_63, %c0_64] : memref<9x8x128xf32, #tpu.memory_space<vmem>>, vector<1x8x128xf32>
    %160 = vector.shape_cast %159 : vector<1x8x128xf32> to vector<8x128xf32>
    %161 = vector.shape_cast %158 : vector<8x128xf32> to vector<1x8x128xf32>
    tpu.vector_store %arg4[%c6, %c0_63, %c0_64], %161 {strides = array<i32>} : memref<9x8x128xf32, #tpu.memory_space<vmem>>, vector<1x8x128xf32>,
    %cst_65 = arith.constant dense<0.000000e+00> : vector<8x32xf32>
    %162 = tpu.matmul %158, %3, %cst_65 {dimension_numbers = #tpu.dot_dimension_numbers<[1], [0], [0], [1], [0, 0, 1, 1], [], []>} : vector<8x128xf32>, vector<128x32xf32>, vector<8x32xf32> -> vector<8x32xf32>
    %cst_66 = arith.constant dense<0.000000e+00> : vector<8x32xf32>
    %163 = tpu.matmul %145, %2, %cst_66 {dimension_numbers = #tpu.dot_dimension_numbers<[1], [0], [0], [1], [0, 0, 1, 1], [], []>} : vector<8x32xf32>, vector<32x32xf32>, vector<8x32xf32> -> vector<8x32xf32>
    %164 = arith.addf %162, %163 : vector<8x32xf32>
    %165 = arith.addf %164, %12 : vector<8x32xf32>
    %166 = math.tanh %165 : vector<8x32xf32>
    %cst_67 = arith.constant dense<0.000000e+00> : vector<8x128xf32>
    %167 = tpu.matmul %166, %13, %cst_67 {dimension_numbers = #tpu.dot_dimension_numbers<[1], [0], [0], [1], [0, 0, 1, 1], [], []>} : vector<8x32xf32>, vector<32x128xf32>, vector<8x128xf32> -> vector<8x128xf32>
    %cst_68 = arith.constant dense<0xFF800000> : vector<8xf32>
    %168 = vector.multi_reduction <maximumf>, %167, %cst_68 [1] : vector<8x128xf32> to vector<8xf32>
    %169 = vector.shape_cast %168 : vector<8xf32> to vector<8x1xf32>
    %170 = vector.broadcast %169 : vector<8x1xf32> to vector<8x128xf32>
    %171 = arith.cmpf oeq, %167, %170 : vector<8x128xf32>
    %c128_i32_69 = arith.constant 128 : i32
    %172 = vector.broadcast %c128_i32_69 : i32 to vector<8x128xi32>
    %173 = arith.select %171, %14, %172 : vector<8x128xi1>, vector<8x128xi32>
    %cst_70 = arith.constant dense<2147483647> : vector<8xi32>
    %174 = vector.multi_reduction <minsi>, %173, %cst_70 [1] : vector<8x128xi32> to vector<8xi32>
    %175 = vector.shape_cast %174 : vector<8xi32> to vector<8x1xi32>
    %176 = vector.broadcast %175 : vector<8x1xi32> to vector<8x128xi32>
    %177 = arith.cmpi eq, %14, %176 : vector<8x128xi32>
    %178 = arith.extui %177 : vector<8x128xi1> to vector<8x128xi32>
    %179 = arith.sitofp %178 : vector<8x128xi32> to vector<8x128xf32>
    %c7 = arith.constant 7 : index
    %c0_71 = arith.constant 0 : index
    %c0_72 = arith.constant 0 : index
    %180 = vector.load %arg4[%c7, %c0_71, %c0_72] : memref<9x8x128xf32, #tpu.memory_space<vmem>>, vector<1x8x128xf32>
    %181 = vector.shape_cast %180 : vector<1x8x128xf32> to vector<8x128xf32>
    %182 = vector.shape_cast %179 : vector<8x128xf32> to vector<1x8x128xf32>
    tpu.vector_store %arg4[%c7, %c0_71, %c0_72], %182 {strides = array<i32>} : memref<9x8x128xf32, #tpu.memory_space<vmem>>, vector<1x8x128xf32>,
    %c0_i32 = arith.constant 0 : i32
    %183 = vector.broadcast %c0_i32 : i32 to vector<8x128xi32>
    %184 = arith.cmpi eq, %14, %183 : vector<8x128xi32>
    %185 = arith.extui %184 : vector<8x128xi1> to vector<8x128xi32>
    %186 = arith.sitofp %185 : vector<8x128xi32> to vector<8x128xf32>
    %c8 = arith.constant 8 : index
    %c0_73 = arith.constant 0 : index
    %c0_74 = arith.constant 0 : index
    %187 = vector.load %arg4[%c8, %c0_73, %c0_74] : memref<9x8x128xf32, #tpu.memory_space<vmem>>, vector<1x8x128xf32>
    %188 = vector.shape_cast %187 : vector<1x8x128xf32> to vector<8x128xf32>
    %189 = vector.shape_cast %186 : vector<8x128xf32> to vector<1x8x128xf32>
    tpu.vector_store %arg4[%c8, %c0_73, %c0_74], %189 {strides = array<i32>} : memref<9x8x128xf32, #tpu.memory_space<vmem>>, vector<1x8x128xf32>,
    %c0_75 = arith.constant 0 : index
    %c0_76 = arith.constant 0 : index
    %c0_77 = arith.constant 0 : index
    %190 = vector.load %arg4[%c0_75, %c0_76, %c0_77] : memref<9x8x128xf32, #tpu.memory_space<vmem>>, vector<1x8x128xf32>
    %191 = vector.shape_cast %190 : vector<1x8x128xf32> to vector<8x128xf32>
    %c0_78 = arith.constant 0 : index
    %c0_79 = arith.constant 0 : index
    %c0_80 = arith.constant 0 : index
    %192 = vector.load %arg3[%c0_78, %c0_79, %c0_80] : memref<8x9x128xf32, #tpu.memory_space<vmem>>, vector<8x1x128xf32>
    %193 = vector.shape_cast %192 : vector<8x1x128xf32> to vector<8x128xf32>
    %194 = vector.shape_cast %191 : vector<8x128xf32> to vector<8x1x128xf32>
    tpu.vector_store %arg3[%c0_78, %c0_79, %c0_80], %194 {strides = array<i32>} : memref<8x9x128xf32, #tpu.memory_space<vmem>>, vector<8x1x128xf32>,
    %c1_81 = arith.constant 1 : index
    %c0_82 = arith.constant 0 : index
    %c0_83 = arith.constant 0 : index
    %195 = vector.load %arg4[%c1_81, %c0_82, %c0_83] : memref<9x8x128xf32, #tpu.memory_space<vmem>>, vector<1x8x128xf32>
    %196 = vector.shape_cast %195 : vector<1x8x128xf32> to vector<8x128xf32>
    %c0_84 = arith.constant 0 : index
    %c1_85 = arith.constant 1 : index
    %c0_86 = arith.constant 0 : index
    %197 = vector.load %arg3[%c0_84, %c1_85, %c0_86] : memref<8x9x128xf32, #tpu.memory_space<vmem>>, vector<8x1x128xf32>
    %198 = vector.shape_cast %197 : vector<8x1x128xf32> to vector<8x128xf32>
    %199 = vector.shape_cast %196 : vector<8x128xf32> to vector<8x1x128xf32>
    tpu.vector_store %arg3[%c0_84, %c1_85, %c0_86], %199 {strides = array<i32>} : memref<8x9x128xf32, #tpu.memory_space<vmem>>, vector<8x1x128xf32>,
    %c2_87 = arith.constant 2 : index
    %c0_88 = arith.constant 0 : index
    %c0_89 = arith.constant 0 : index
    %200 = vector.load %arg4[%c2_87, %c0_88, %c0_89] : memref<9x8x128xf32, #tpu.memory_space<vmem>>, vector<1x8x128xf32>
    %201 = vector.shape_cast %200 : vector<1x8x128xf32> to vector<8x128xf32>
    %c0_90 = arith.constant 0 : index
    %c2_91 = arith.constant 2 : index
    %c0_92 = arith.constant 0 : index
    %202 = vector.load %arg3[%c0_90, %c2_91, %c0_92] : memref<8x9x128xf32, #tpu.memory_space<vmem>>, vector<8x1x128xf32>
    %203 = vector.shape_cast %202 : vector<8x1x128xf32> to vector<8x128xf32>
    %204 = vector.shape_cast %201 : vector<8x128xf32> to vector<8x1x128xf32>
    tpu.vector_store %arg3[%c0_90, %c2_91, %c0_92], %204 {strides = array<i32>} : memref<8x9x128xf32, #tpu.memory_space<vmem>>, vector<8x1x128xf32>,
    %c3_93 = arith.constant 3 : index
    %c0_94 = arith.constant 0 : index
    %c0_95 = arith.constant 0 : index
    %205 = vector.load %arg4[%c3_93, %c0_94, %c0_95] : memref<9x8x128xf32, #tpu.memory_space<vmem>>, vector<1x8x128xf32>
    %206 = vector.shape_cast %205 : vector<1x8x128xf32> to vector<8x128xf32>
    %c0_96 = arith.constant 0 : index
    %c3_97 = arith.constant 3 : index
    %c0_98 = arith.constant 0 : index
    %207 = vector.load %arg3[%c0_96, %c3_97, %c0_98] : memref<8x9x128xf32, #tpu.memory_space<vmem>>, vector<8x1x128xf32>
    %208 = vector.shape_cast %207 : vector<8x1x128xf32> to vector<8x128xf32>
    %209 = vector.shape_cast %206 : vector<8x128xf32> to vector<8x1x128xf32>
    tpu.vector_store %arg3[%c0_96, %c3_97, %c0_98], %209 {strides = array<i32>} : memref<8x9x128xf32, #tpu.memory_space<vmem>>, vector<8x1x128xf32>,
    %c4_99 = arith.constant 4 : index
    %c0_100 = arith.constant 0 : index
    %c0_101 = arith.constant 0 : index
    %210 = vector.load %arg4[%c4_99, %c0_100, %c0_101] : memref<9x8x128xf32, #tpu.memory_space<vmem>>, vector<1x8x128xf32>
    %211 = vector.shape_cast %210 : vector<1x8x128xf32> to vector<8x128xf32>
    %c0_102 = arith.constant 0 : index
    %c4_103 = arith.constant 4 : index
    %c0_104 = arith.constant 0 : index
    %212 = vector.load %arg3[%c0_102, %c4_103, %c0_104] : memref<8x9x128xf32, #tpu.memory_space<vmem>>, vector<8x1x128xf32>
    %213 = vector.shape_cast %212 : vector<8x1x128xf32> to vector<8x128xf32>
    %214 = vector.shape_cast %211 : vector<8x128xf32> to vector<8x1x128xf32>
    tpu.vector_store %arg3[%c0_102, %c4_103, %c0_104], %214 {strides = array<i32>} : memref<8x9x128xf32, #tpu.memory_space<vmem>>, vector<8x1x128xf32>,
    %c5_105 = arith.constant 5 : index
    %c0_106 = arith.constant 0 : index
    %c0_107 = arith.constant 0 : index
    %215 = vector.load %arg4[%c5_105, %c0_106, %c0_107] : memref<9x8x128xf32, #tpu.memory_space<vmem>>, vector<1x8x128xf32>
    %216 = vector.shape_cast %215 : vector<1x8x128xf32> to vector<8x128xf32>
    %c0_108 = arith.constant 0 : index
    %c5_109 = arith.constant 5 : index
    %c0_110 = arith.constant 0 : index
    %217 = vector.load %arg3[%c0_108, %c5_109, %c0_110] : memref<8x9x128xf32, #tpu.memory_space<vmem>>, vector<8x1x128xf32>
    %218 = vector.shape_cast %217 : vector<8x1x128xf32> to vector<8x128xf32>
    %219 = vector.shape_cast %216 : vector<8x128xf32> to vector<8x1x128xf32>
    tpu.vector_store %arg3[%c0_108, %c5_109, %c0_110], %219 {strides = array<i32>} : memref<8x9x128xf32, #tpu.memory_space<vmem>>, vector<8x1x128xf32>,
    %c6_111 = arith.constant 6 : index
    %c0_112 = arith.constant 0 : index
    %c0_113 = arith.constant 0 : index
    %220 = vector.load %arg4[%c6_111, %c0_112, %c0_113] : memref<9x8x128xf32, #tpu.memory_space<vmem>>, vector<1x8x128xf32>
    %221 = vector.shape_cast %220 : vector<1x8x128xf32> to vector<8x128xf32>
    %c0_114 = arith.constant 0 : index
    %c6_115 = arith.constant 6 : index
    %c0_116 = arith.constant 0 : index
    %222 = vector.load %arg3[%c0_114, %c6_115, %c0_116] : memref<8x9x128xf32, #tpu.memory_space<vmem>>, vector<8x1x128xf32>
    %223 = vector.shape_cast %222 : vector<8x1x128xf32> to vector<8x128xf32>
    %224 = vector.shape_cast %221 : vector<8x128xf32> to vector<8x1x128xf32>
    tpu.vector_store %arg3[%c0_114, %c6_115, %c0_116], %224 {strides = array<i32>} : memref<8x9x128xf32, #tpu.memory_space<vmem>>, vector<8x1x128xf32>,
    %c7_117 = arith.constant 7 : index
    %c0_118 = arith.constant 0 : index
    %c0_119 = arith.constant 0 : index
    %225 = vector.load %arg4[%c7_117, %c0_118, %c0_119] : memref<9x8x128xf32, #tpu.memory_space<vmem>>, vector<1x8x128xf32>
    %226 = vector.shape_cast %225 : vector<1x8x128xf32> to vector<8x128xf32>
    %c0_120 = arith.constant 0 : index
    %c7_121 = arith.constant 7 : index
    %c0_122 = arith.constant 0 : index
    %227 = vector.load %arg3[%c0_120, %c7_121, %c0_122] : memref<8x9x128xf32, #tpu.memory_space<vmem>>, vector<8x1x128xf32>
    %228 = vector.shape_cast %227 : vector<8x1x128xf32> to vector<8x128xf32>
    %229 = vector.shape_cast %226 : vector<8x128xf32> to vector<8x1x128xf32>
    tpu.vector_store %arg3[%c0_120, %c7_121, %c0_122], %229 {strides = array<i32>} : memref<8x9x128xf32, #tpu.memory_space<vmem>>, vector<8x1x128xf32>,
    %c8_123 = arith.constant 8 : index
    %c0_124 = arith.constant 0 : index
    %c0_125 = arith.constant 0 : index
    %230 = vector.load %arg4[%c8_123, %c0_124, %c0_125] : memref<9x8x128xf32, #tpu.memory_space<vmem>>, vector<1x8x128xf32>
    %231 = vector.shape_cast %230 : vector<1x8x128xf32> to vector<8x128xf32>
    %c0_126 = arith.constant 0 : index
    %c8_127 = arith.constant 8 : index
    %c0_128 = arith.constant 0 : index
    %232 = vector.load %arg3[%c0_126, %c8_127, %c0_128] : memref<8x9x128xf32, #tpu.memory_space<vmem>>, vector<8x1x128xf32>
    %233 = vector.shape_cast %232 : vector<8x1x128xf32> to vector<8x128xf32>
    %234 = vector.shape_cast %231 : vector<8x128xf32> to vector<8x1x128xf32>
    tpu.vector_store %arg3[%c0_126, %c8_127, %c0_128], %234 {strides = array<i32>} : memref<8x9x128xf32, #tpu.memory_space<vmem>>, vector<8x1x128xf32>,
    return
  }
}

</mosaic_0001>

<bundles_post_ra>
// kernel: tpu_custom_call.1
= control target key start
LH: loop header
LB: loop body
LE: loop exit
PB: predicated region body
PF: predicated region fallthrough
CT: control target
= control target key end

     0   :  { %vm49_vm0 = vcmask 130048   ;;  %vm73_vm1 = vcmask 261120   ;;  %v47_v19 = vlaneseq  ;;  %v1038_v45 = vmov 0.0   ;;  %s1650_s1 = inlined_call_operand.vmem [shape: f32[179,32], index: 1, kind: input, shape index: {}]   ;;  %s1651_s0 = inlined_call_operand.vmem [shape: f32[8,16], index: 0, kind: input, shape index: {}]   ;;  %s1652_s2 = inlined_call_operand.vmem [shape: f32[32,128], index: 2, kind: input, shape index: {}]   ;;  %s1653_s3 = inlined_call_operand.vmem [shape: f32[8,9,128], index: 3, kind: output, shape index: {}]  }
   0x1   :  { %v16_v0 = vld [vmem:[%s1650_s1 + $0x8] sm:$0xff]  ;;  %v15_v1 = vld [vmem:[%s1650_s1] sm:$0xff]  ;;  %v1086_v5 = vld [vmem:[%s1650_s1 + $0x18] sm:$0xff]  ;;  %v1039_v60 = vmov 1.0  }
   0x2   :  { %v14_v2 = vld [vmem:[%s1651_s0] sm:$0xff]  ;;  %67 = vmatpush.msra.mxu0 %v16_v0  ;;  %v1072_v3 = vld [vmem:[%s1650_s1 + $0x28] sm:$0xff]  ;;  %v1093_v6 = vld [vmem:[%s1650_s1 + $0x10] sm:$0xff]  ;;  %v1142_v20 = vand.u32 127, %v47_v19 }
   0x3   :  { %v1077_v4 = vld [vmem:[%s1650_s1 + $0x20] sm:$0xff]  ;;  %89 = vmatpush.msra.mxu2 %v1072_v3  ;;  %155 = vmatpush.msra.mxu3 %v1072_v3  ;;  %v1019_v7 = vld [vmem:[%s1650_s1 + $0xb0] ss:$0 sm:$0xff]  ;;  %v1104_v10 = vld [vmem:[%s1652_s2 + $0x18] sm:$0xff] }
   0x4   :  { %68 = vmatpush.msra.mxu0 %v15_v1  ;;  %v1110_v11 = vld [vmem:[%s1652_s2 + $0x10] sm:$0xff]  ;;  %288 = vmatpush.msra.mxu1 %v1104_v10  ;;  %v1116_v12 = vld [vmem:[%s1652_s2 + $0x8] sm:$0xff]  ;;  %v1123_v13 = vld [vmem:[%s1652_s2] sm:$0xff]  ;;  %vm759_vm4 = vcmp.eq.s32.totalorder %v1142_v20, 0 }
   0x5   :  { %984 = vmatmul.msk.f32.vlgmr.msra.gmra.mxu0 %vm49_vm0, %v14_v2  ;;  %90 = vmatpush.msra.mxu2 %v1077_v4  ;;  %v1020_v14 = vld [vmem:[%s1650_s1 + $0xb1] ss:$0 sm:$0xff]  ;;  %v1148_v25 = vld [vmem:[%s1650_s1 + $0xa8] sm:$0xff]  ;;  %v1153_v26 = vld [vmem:[%s1650_s1 + $0xa0] sm:$0xff]  ;;  %v1016_v46 = vsel %vm759_vm4, 1.0, %v1038_v45 }
   0x6   :  { %156 = vmatpush.msra.mxu3 %v1077_v4  ;;  %289 = vmatpush.msra.mxu1 %v1110_v11  ;;  %v1160_v27 = vld [vmem:[%s1650_s1 + $0x98] sm:$0xff]  ;;  %v1168_v28 = vld [vmem:[%s1650_s1 + $0x90] sm:$0xff]  ;;  %v1176_v29 = vld [vmem:[%s1650_s1 + $0x88] sm:$0xff]  ;;  %972 = vst [vmem:[%s1653_s3 + $0x8] sm:$0x1] %v1016_v46  ;;  %v958_v47 = vrot.slane %v1016_v46, 1 }
   0x7   :  { %91 = vmatpush.msra.mxu2 %v1086_v5  ;;  %163 = vmatpush.msrb.mxu0 %v1148_v25  ;;  %v1184_v30 = vld [vmem:[%s1650_s1 + $0x80] sm:$0xff]  ;;  %v1192_v31 = vld [vmem:[%s1650_s1 + $0x78] sm:$0xff]  ;;  %v1200_v32 = vld [vmem:[%s1650_s1 + $0x70] sm:$0xff]  ;;  %v959_v48 = vrot.slane %v1016_v46, 2  ;;  %v960_v49 = vrot.slane %v1016_v46, 3  ;;  %v961_v50 = vrot.slane %v1016_v46, 4 }
   0x8   :  { %157 = vmatpush.msra.mxu3 %v1086_v5  ;;  %290 = vmatpush.msra.mxu1 %v1116_v12  ;;  %v1208_v33 = vld [vmem:[%s1650_s1 + $0x68] sm:$0xff]  ;;  %v1216_v34 = vld [vmem:[%s1650_s1 + $0x60] sm:$0xff]  ;;  %v1224_v35 = vld [vmem:[%s1650_s1 + $0x58] sm:$0xff]  ;;  %v962_v51 = vrot.slane %v1016_v46, 5  ;;  %973 = vst [vmem:[%s1653_s3 + $0x18] sm:$0x1] %v958_v47 }
   0x9   :  { %92 = vmatpush.msra.mxu2 %v1093_v6  ;;  %164 = vmatpush.msrb.mxu0 %v1153_v26  ;;  %v1232_v36 = vld [vmem:[%s1650_s1 + $0x50] sm:$0xff]  ;;  %v1240_v37 = vld [vmem:[%s1650_s1 + $0x48] sm:$0xff]  ;;  %v1252_v42 = vld [vmem:[%s1650_s1 + $0x40] sm:$0xff]  ;;  %v963_v52 = vrot.slane %v1016_v46, 6  ;;  %974 = vst [vmem:[%s1653_s3 + $0x28] sm:$0x1] %v959_v48 }
   0xa   :  { %158 = vmatpush.msra.mxu3 %v1093_v6  ;;  %291 = vmatpush.msra.mxu1 %v1123_v13  ;;  %v1259_v43 = vld [vmem:[%s1650_s1 + $0x38] sm:$0xff]  ;;  %v1266_v44 = vld [vmem:[%s1650_s1 + $0x30] sm:$0xff]  ;;  %v964_v53 = vrot.slane %v1016_v46, 7  ;;  %975 = vst [vmem:[%s1653_s3 + $0x38] sm:$0x1] %v960_v49 }
   0xb   :  { %113 = vmatpush.msrb.mxu2 %v1104_v10  ;;  %165 = vmatpush.msrb.mxu0 %v1160_v27  ;;  %976 = vst [vmem:[%s1653_s3 + $0x48] sm:$0x1] %v961_v50 }
   0xc   :  { %251 = vmatpush.msrb.mxu3 %v1148_v25  ;;  %339 = vmatpush.msrb.mxu1 %v1148_v25  ;;  %977 = vst [vmem:[%s1653_s3 + $0x58] sm:$0x1] %v962_v51 }
   0xd   :  { %114 = vmatpush.msrb.mxu2 %v1110_v11  ;;  %166 = vmatpush.msrb.mxu0 %v1168_v28  ;;  %978 = vst [vmem:[%s1653_s3 + $0x68] sm:$0x1] %v963_v52 }
   0xe   :  { %252 = vmatpush.msrb.mxu3 %v1153_v26  ;;  %340 = vmatpush.msrb.mxu1 %v1153_v26  ;;  %979 = vst [vmem:[%s1653_s3 + $0x78] sm:$0x1] %v964_v53 }
   0xf   :  { %115 = vmatpush.msrb.mxu2 %v1116_v12  ;;  %167 = vmatpush.msrb.mxu0 %v1176_v29 }
  0x10   :  { %253 = vmatpush.msrb.mxu3 %v1160_v27  ;;  %341 = vmatpush.msrb.mxu1 %v1160_v27 }
  0x11   :  { %116 = vmatpush.msrb.mxu2 %v1123_v13  ;;  %168 = vmatpush.msrb.mxu0 %v1184_v30 }
  0x12   :  { %254 = vmatpush.msrb.mxu3 %v1168_v28  ;;  %342 = vmatpush.msrb.mxu1 %v1168_v28 }
  0x13   :  { %169 = vmatpush.msrb.mxu0 %v1192_v31 }
  0x14   :  { %255 = vmatpush.msrb.mxu3 %v1176_v29  ;;  %343 = vmatpush.msrb.mxu1 %v1176_v29 }
  0x15   :  { %170 = vmatpush.msrb.mxu0 %v1200_v32 }
  0x16   :  { %256 = vmatpush.msrb.mxu3 %v1184_v30  ;;  %344 = vmatpush.msrb.mxu1 %v1184_v30 }
  0x17   :  { %171 = vmatpush.msrb.mxu0 %v1208_v33 }
  0x18   :  { %257 = vmatpush.msrb.mxu3 %v1192_v31  ;;  %345 = vmatpush.msrb.mxu1 %v1192_v31 }
  0x19   :  { %172 = vmatpush.msrb.mxu0 %v1216_v34 }
  0x1a   :  { %258 = vmatpush.msrb.mxu3 %v1200_v32  ;;  %346 = vmatpush.msrb.mxu1 %v1200_v32 }
  0x1b   :  { %173 = vmatpush.msrb.mxu0 %v1224_v35 }
  0x1c   :  { %259 = vmatpush.msrb.mxu3 %v1208_v33  ;;  %347 = vmatpush.msrb.mxu1 %v1208_v33 }
  0x1d   :  { %174 = vmatpush.msrb.mxu0 %v1232_v36 }
  0x1e   :  { %260 = vmatpush.msrb.mxu3 %v1216_v34  ;;  %348 = vmatpush.msrb.mxu1 %v1216_v34 }
  0x1f   :  { %175 = vmatpush.msrb.mxu0 %v1240_v37 }
  0x20   :  { %261 = vmatpush.msrb.mxu3 %v1224_v35  ;;  %349 = vmatpush.msrb.mxu1 %v1224_v35 }
  0x21   :  { %176 = vmatpush.msrb.mxu0 %v1252_v42 }
  0x22   :  { %262 = vmatpush.msrb.mxu3 %v1232_v36  ;;  %350 = vmatpush.msrb.mxu1 %v1232_v36 }
  0x23   :  { %177 = vmatpush.msrb.mxu0 %v1259_v43 }
  0x24   :  { %263 = vmatpush.msrb.mxu3 %v1240_v37  ;;  %351 = vmatpush.msrb.mxu1 %v1240_v37 }
  0x25   :  { %178 = vmatpush.msrb.mxu0 %v1266_v44 }
  0x26   :  { %264 = vmatpush.msrb.mxu3 %v1252_v42  ;;  %352 = vmatpush.msrb.mxu1 %v1252_v42 }
  0x27   :  { %200 = vmatpush.msra.mxu0 %v1104_v10 }
  0x28   :  { %265 = vmatpush.msrb.mxu3 %v1259_v43  ;;  %353 = vmatpush.msrb.mxu1 %v1259_v43 }
  0x29   :  { %201 = vmatpush.msra.mxu0 %v1110_v11 }
  0x2a   :  { %266 = vmatpush.msrb.mxu3 %v1266_v44  ;;  %354 = vmatpush.msrb.mxu1 %v1266_v44 }
  0x2b   :  { %202 = vmatpush.msra.mxu0 %v1116_v12 }
  0x2d   :  { %203 = vmatpush.msra.mxu0 %v1123_v13 }
  0x82   :  { %v70_v8 = vpop.f32.mrf.mxu0 }
  0x83   :  { %v71_v9 = vadd.f32 %v1019_v7, %v70_v8  ;;  %v1353_v8 = vld [vmem:[%s1650_s1 + $0xb2] ss:$0 sm:$0xff] }
  0x85   :  { %985 = vmatmul.msk.f32.vlgmr.msra.gmra.mxu2 %vm73_vm1, %v71_v9 }
  0x86   :  { %243 = vmatpush.msra.mxu2 %v1072_v3 }
  0x88   :  { %244 = vmatpush.msra.mxu2 %v1077_v4 }
  0x8a   :  { %245 = vmatpush.msra.mxu2 %v1086_v5 }
  0x8c   :  { %246 = vmatpush.msra.mxu2 %v1093_v6 }
 0x108   :  { %v94_v15 = vpop.f32.mrf.mxu2 }
 0x109   :  { %v95_v16 = vadd.f32 %v1020_v14, %v94_v15 }
 0x10b   :  { %1022 = vtanh.f32 %v95_v16 }
 0x111   :  { %v1023_v17 = vpop.eup %1022 }
 0x112   :  { %986 = vmatmul.msk.f32.vlgmr.msrb.gmra.mxu2 %vm73_vm1, %v1023_v17  ;;  %988 = vmatmul.msk.f32.vlgmr.msra.gmra.mxu3 %vm73_vm1, %v1023_v17 }
 0x113   :  { %331 = vmatpush.msrb.mxu2 %v1072_v3  ;;  %507 = vmatpush.msra.mxu3 %v1072_v3 }
 0x115   :  { %332 = vmatpush.msrb.mxu2 %v1077_v4  ;;  %508 = vmatpush.msra.mxu3 %v1077_v4 }
 0x117   :  { %333 = vmatpush.msrb.mxu2 %v1086_v5  ;;  %509 = vmatpush.msra.mxu3 %v1086_v5 }
 0x119   :  { %334 = vmatpush.msrb.mxu2 %v1093_v6  ;;  %510 = vmatpush.msra.mxu3 %v1093_v6 }
 0x195   :  { %v118_v18 = vpop.f32.mrf.mxu2  ;;  %v160_v9 = vpop.f32.mrf.mxu3 }
 0x196   :  { %121 = vmax.xlane.f32.xlu0 %v118_v18 }
 0x209   :  { %v122_v21 = vpop.xlane.xlu0 %121 }
 0x20a   :  { %vm123_vm2 = vcmp.eq.f32.partialorder %v118_v18, %v122_v21 }
 0x20b   :  { %v124_v22 = vsel %vm123_vm2, %v1142_v20, 128 }
 0x20c   :  { %v126_v23 = vshra.s32 %v124_v22, 16  ;;  %v125_v38 = vand.u32 65535, %v124_v22 }
 0x20e   :  { %v128_v24 = vcvt.s32.f32 %v126_v23  ;;  %v127_v40 = vcvt.s32.f32 %v125_v38 }
 0x210   :  { %129 = vmin.xlane.f32.xlu0 %v128_v24 }
 0x283   :  { %v130_v39 = vpop.xlane.xlu0 %129 }
 0x284   :  { %vm131_vm3 = vcmp.eq.f32.partialorder %v128_v24, %v130_v39  ;;  %v136_v54 = vcvt.f32.s32 %v130_v39 }
 0x285   :  { %v132_v41 = vsel %vm131_vm3, %v127_v40, inf }
 0x286   :  { %133 = vmin.xlane.f32.xlu1 %v132_v41  ;;  %v137_v56 = vshll.u32 %v136_v54, 16 }
 0x2f9   :  { %v134_v55 = vpop.xlane.xlu1 %133 }
 0x2fa   :  { %v135_v57 = vcvt.f32.s32 %v134_v55 }
 0x2fc   :  { %v138_v58 = vadd.s32 %v137_v56, %v135_v57 }
 0x2fe   :  { %vm139_vm5 = vcmp.eq.s32.totalorder %v1142_v20, %v138_v58 }
 0x2ff   :  { %v987_v59 = vsel %vm139_vm5, 1.0, %v1038_v45  ;;  %989 = vmatmul.msk.f32.vlgmr.msrb.gmra.mxu0 %vm139_vm5, %v1039_v60 }
 0x300   :  { %v766_v61 = vrot.slane %v987_v59, 1  ;;  %v767_v62 = vrot.slane %v987_v59, 2  ;;  %v768_v63 = vrot.slane %v987_v59, 3  ;;  %780 = vst [vmem:[%s1653_s3] sm:$0x1] %v987_v59  ;;  %427 = vmatpush.msrb.mxu0 %v1148_v25  ;;  %v769_v0 = vrot.slane %v987_v59, 4 }
 0x301   :  { %v770_v1 = vrot.slane %v987_v59, 5  ;;  %v771_v2 = vrot.slane %v987_v59, 6  ;;  %v772_v7 = vrot.slane %v987_v59, 7 }
 0x302   :  { %781 = vst [vmem:[%s1653_s3 + $0x10] sm:$0x1] %v766_v61  ;;  %428 = vmatpush.msrb.mxu0 %v1153_v26 }
 0x303   :  { %782 = vst [vmem:[%s1653_s3 + $0x20] sm:$0x1] %v767_v62 }
 0x304   :  { %783 = vst [vmem:[%s1653_s3 + $0x30] sm:$0x1] %v768_v63  ;;  %429 = vmatpush.msrb.mxu0 %v1160_v27 }
 0x305   :  { %784 = vst [vmem:[%s1653_s3 + $0x40] sm:$0x1] %v769_v0 }
 0x306   :  { %785 = vst [vmem:[%s1653_s3 + $0x50] sm:$0x1] %v770_v1  ;;  %430 = vmatpush.msrb.mxu0 %v1168_v28 }
 0x307   :  { %786 = vst [vmem:[%s1653_s3 + $0x60] sm:$0x1] %v771_v2 }
 0x308   :  { %787 = vst [vmem:[%s1653_s3 + $0x70] sm:$0x1] %v772_v7  ;;  %431 = vmatpush.msrb.mxu0 %v1176_v29 }
 0x30a   :  { %432 = vmatpush.msrb.mxu0 %v1184_v30 }
 0x30c   :  { %433 = vmatpush.msrb.mxu0 %v1192_v31 }
 0x30e   :  { %434 = vmatpush.msrb.mxu0 %v1200_v32 }
 0x310   :  { %435 = vmatpush.msrb.mxu0 %v1208_v33 }
 0x312   :  { %436 = vmatpush.msrb.mxu0 %v1216_v34 }
 0x314   :  { %437 = vmatpush.msrb.mxu0 %v1224_v35 }
 0x316   :  { %438 = vmatpush.msrb.mxu0 %v1232_v36 }
 0x318   :  { %439 = vmatpush.msrb.mxu0 %v1240_v37 }
 0x31a   :  { %440 = vmatpush.msrb.mxu0 %v1252_v42 }
 0x31c   :  { %441 = vmatpush.msrb.mxu0 %v1259_v43 }
 0x31e   :  { %442 = vmatpush.msrb.mxu0 %v1266_v44 }
 0x37c   :  { %v180_v14 = vpop.f32.mrf.mxu0 }
 0x37d   :  { %v181_v15 = vadd.f32 %v180_v14, %v160_v9 }
 0x37f   :  { %v183_v16 = vadd.f32 %v1353_v8, %v181_v15 }
 0x381   :  { %1024 = vtanh.f32 %v183_v16 }
 0x387   :  { %v1025_v17 = vpop.eup %1024 }
 0x388   :  { %990 = vmatmul.msk.f32.vlgmr.msra.gmra.mxu0 %vm73_vm1, %v1025_v17  ;;  %992 = vmatmul.msk.f32.vlgmr.msra.gmra.mxu2 %vm73_vm1, %v1025_v17 }
 0x389   :  { %376 = vmatpush.msra.mxu2 %v1104_v10  ;;  %683 = vmatpush.msra.mxu0 %v1072_v3 }
 0x38b   :  { %377 = vmatpush.msra.mxu2 %v1110_v11  ;;  %684 = vmatpush.msra.mxu0 %v1077_v4 }
 0x38d   :  { %378 = vmatpush.msra.mxu2 %v1116_v12  ;;  %685 = vmatpush.msra.mxu0 %v1086_v5 }
 0x38f   :  { %379 = vmatpush.msra.mxu2 %v1123_v13  ;;  %686 = vmatpush.msra.mxu0 %v1093_v6 }
 0x405   :  { %v205_v18 = vpop.f32.mrf.mxu0 }
 0x406   :  { %208 = vmax.xlane.f32.xlu1 %v205_v18 }
 0x40b   :  { %v248_v58 = vpop.f32.mrf.mxu2 }
 0x479   :  { %v209_v19 = vpop.xlane.xlu1 %208 }
 0x47a   :  { %vm210_vm6 = vcmp.eq.f32.partialorder %v205_v18, %v209_v19 }
 0x47b   :  { %v211_v21 = vsel %vm210_vm6, %v1142_v20, 128 }
 0x47c   :  { %v213_v22 = vshra.s32 %v211_v21, 16  ;;  %v212_v24 = vand.u32 65535, %v211_v21 }
 0x47e   :  { %v215_v23 = vcvt.s32.f32 %v213_v22  ;;  %v214_v39 = vcvt.s32.f32 %v212_v24 }
 0x480   :  { %216 = vmin.xlane.f32.xlu2 %v215_v23 }
 0x4f3   :  { %v217_v38 = vpop.xlane.xlu2 %216 }
 0x4f4   :  { %vm218_vm7 = vcmp.eq.f32.partialorder %v215_v23, %v217_v38  ;;  %v223_v41 = vcvt.f32.s32 %v217_v38 }
 0x4f5   :  { %v219_v40 = vsel %vm218_vm7, %v214_v39, inf }
 0x4f6   :  { %220 = vmin.xlane.f32.xlu2 %v219_v40  ;;  %v224_v47 = vshll.u32 %v223_v41, 16 }
 0x569   :  { %v221_v46 = vpop.xlane.xlu2 %220 }
 0x56a   :  { %v222_v48 = vcvt.f32.s32 %v221_v46 }
 0x56c   :  { %v225_v49 = vadd.s32 %v224_v47, %v222_v48 }
 0x56e   :  { %vm226_vm8 = vcmp.eq.s32.totalorder %v1142_v20, %v225_v49 }
 0x56f   :  { %v991_v50 = vsel %vm226_vm8, 1.0, %v1038_v45  ;;  %993 = vmatmul.msk.f32.vlgmr.msrb.gmra.mxu3 %vm226_vm8, %v1039_v60 }
 0x570   :  { %v790_v51 = vrot.slane %v991_v50, 1  ;;  %v791_v52 = vrot.slane %v991_v50, 2  ;;  %v792_v53 = vrot.slane %v991_v50, 3  ;;  %804 = vst [vmem:[%s1653_s3 + $0x1] sm:$0x1] %v991_v50  ;;  %552 = vmatpush.msrb.mxu3 %v1104_v10  ;;  %v793_v54 = vrot.slane %v991_v50, 4 }
 0x571   :  { %v794_v55 = vrot.slane %v991_v50, 5  ;;  %v795_v56 = vrot.slane %v991_v50, 6  ;;  %v796_v57 = vrot.slane %v991_v50, 7 }
 0x572   :  { %805 = vst [vmem:[%s1653_s3 + $0x11] sm:$0x1] %v790_v51  ;;  %553 = vmatpush.msrb.mxu3 %v1110_v11 }
 0x573   :  { %806 = vst [vmem:[%s1653_s3 + $0x21] sm:$0x1] %v791_v52 }
 0x574   :  { %807 = vst [vmem:[%s1653_s3 + $0x31] sm:$0x1] %v792_v53  ;;  %554 = vmatpush.msrb.mxu3 %v1116_v12 }
 0x575   :  { %808 = vst [vmem:[%s1653_s3 + $0x41] sm:$0x1] %v793_v54 }
 0x576   :  { %809 = vst [vmem:[%s1653_s3 + $0x51] sm:$0x1] %v794_v55  ;;  %555 = vmatpush.msrb.mxu3 %v1123_v13 }
 0x577   :  { %810 = vst [vmem:[%s1653_s3 + $0x61] sm:$0x1] %v795_v56 }
 0x578   :  { %811 = vst [vmem:[%s1653_s3 + $0x71] sm:$0x1] %v796_v57 }
 0x5f2   :  { %v268_v59 = vpop.f32.mrf.mxu3 }
 0x5f3   :  { %v269_v61 = vadd.f32 %v268_v59, %v248_v58 }
 0x5f5   :  { %v271_v62 = vadd.f32 %v1353_v8, %v269_v61 }
 0x5f7   :  { %1026 = vtanh.f32 %v271_v62 }
 0x5fd   :  { %v1027_v63 = vpop.eup %1026 }
 0x5fe   :  { %994 = vmatmul.msk.f32.vlgmr.msra.gmra.mxu1 %vm73_vm1, %v1027_v63  ;;  %996 = vmatmul.msk.f32.vlgmr.msrb.gmra.mxu2 %vm73_vm1, %v1027_v63 }
 0x5ff   :  { %419 = vmatpush.msrb.mxu2 %v1072_v3  ;;  %595 = vmatpush.msra.mxu1 %v1072_v3 }
 0x601   :  { %420 = vmatpush.msrb.mxu2 %v1077_v4  ;;  %596 = vmatpush.msra.mxu1 %v1077_v4 }
 0x603   :  { %421 = vmatpush.msrb.mxu2 %v1086_v5  ;;  %597 = vmatpush.msra.mxu1 %v1086_v5 }
 0x605   :  { %422 = vmatpush.msrb.mxu2 %v1093_v6  ;;  %598 = vmatpush.msra.mxu1 %v1093_v6 }
 0x67b   :  { %v293_v0 = vpop.f32.mrf.mxu1 }
 0x67c   :  { %296 = vmax.xlane.f32.xlu0 %v293_v0 }
 0x681   :  { %v336_v41 = vpop.f32.mrf.mxu2 }
 0x6ef   :  { %v297_v1 = vpop.xlane.xlu0 %296 }
 0x6f0   :  { %vm298_vm9 = vcmp.eq.f32.partialorder %v293_v0, %v297_v1 }
 0x6f1   :  { %v299_v2 = vsel %vm298_vm9, %v1142_v20, 128 }
 0x6f2   :  { %v301_v7 = vshra.s32 %v299_v2, 16  ;;  %v300_v9 = vand.u32 65535, %v299_v2 }
 0x6f4   :  { %v303_v3 = vcvt.s32.f32 %v301_v7  ;;  %v302_v4 = vcvt.s32.f32 %v300_v9 }
 0x6f6   :  { %304 = vmin.xlane.f32.xlu1 %v303_v3 }
 0x769   :  { %v305_v14 = vpop.xlane.xlu1 %304 }
 0x76a   :  { %vm306_vm10 = vcmp.eq.f32.partialorder %v303_v3, %v305_v14  ;;  %v311_v5 = vcvt.f32.s32 %v305_v14 }
 0x76b   :  { %v307_v15 = vsel %vm306_vm10, %v302_v4, inf }
 0x76c   :  { %308 = vmin.xlane.f32.xlu2 %v307_v15  ;;  %v312_v17 = vshll.u32 %v311_v5, 16 }
 0x7df   :  { %v309_v16 = vpop.xlane.xlu2 %308 }
 0x7e0   :  { %v310_v18 = vcvt.f32.s32 %v309_v16 }
 0x7e2   :  { %v313_v6 = vadd.s32 %v312_v17, %v310_v18 }
 0x7e4   :  { %vm314_vm11 = vcmp.eq.s32.totalorder %v1142_v20, %v313_v6 }
 0x7e5   :  { %v995_v19 = vsel %vm314_vm11, 1.0, %v1038_v45  ;;  %997 = vmatmul.msk.f32.vlgmr.msrb.gmra.mxu1 %vm314_vm11, %v1039_v60 }
 0x7e6   :  { %v814_v21 = vrot.slane %v995_v19, 1  ;;  %v815_v22 = vrot.slane %v995_v19, 2  ;;  %v816_v23 = vrot.slane %v995_v19, 3  ;;  %828 = vst [vmem:[%s1653_s3 + $0x2] sm:$0x1] %v995_v19  ;;  %640 = vmatpush.msrb.mxu1 %v1104_v10  ;;  %v817_v24 = vrot.slane %v995_v19, 4 }
 0x7e7   :  { %v818_v38 = vrot.slane %v995_v19, 5  ;;  %v819_v39 = vrot.slane %v995_v19, 6  ;;  %v820_v40 = vrot.slane %v995_v19, 7 }
 0x7e8   :  { %829 = vst [vmem:[%s1653_s3 + $0x12] sm:$0x1] %v814_v21  ;;  %641 = vmatpush.msrb.mxu1 %v1110_v11 }
 0x7e9   :  { %830 = vst [vmem:[%s1653_s3 + $0x22] sm:$0x1] %v815_v22 }
 0x7ea   :  { %831 = vst [vmem:[%s1653_s3 + $0x32] sm:$0x1] %v816_v23  ;;  %642 = vmatpush.msrb.mxu1 %v1116_v12 }
 0x7eb   :  { %832 = vst [vmem:[%s1653_s3 + $0x42] sm:$0x1] %v817_v24 }
 0x7ec   :  { %833 = vst [vmem:[%s1653_s3 + $0x52] sm:$0x1] %v818_v38  ;;  %643 = vmatpush.msrb.mxu1 %v1123_v13 }
 0x7ed   :  { %834 = vst [vmem:[%s1653_s3 + $0x62] sm:$0x1] %v819_v39 }
 0x7ee   :  { %835 = vst [vmem:[%s1653_s3 + $0x72] sm:$0x1] %v820_v40 }
 0x862   :  { %v356_v46 = vpop.f32.mrf.mxu1 }
 0x863   :  { %v357_v47 = vadd.f32 %v356_v46, %v336_v41 }
 0x865   :  { %v359_v48 = vadd.f32 %v1353_v8, %v357_v47 }
 0x867   :  { %1028 = vtanh.f32 %v359_v48 }
 0x86d   :  { %v1029_v49 = vpop.eup %1028 }
 0x86e   :  { %998 = vmatmul.msk.f32.vlgmr.msra.gmra.mxu2 %vm73_vm1, %v1029_v49 }
 0x86f   :  { %464 = vmatpush.msra.mxu2 %v1104_v10 }
 0x871   :  { %465 = vmatpush.msra.mxu2 %v1110_v11 }
 0x873   :  { %466 = vmatpush.msra.mxu2 %v1116_v12 }
 0x875   :  { %467 = vmatpush.msra.mxu2 %v1123_v13 }
 0x876   :  { %1000 = vmatmul.msk.f32.vlgmr.msrb.gmra.mxu2 %vm73_vm1, %v1029_v49 }
 0x877   :  { %515 = vmatpush.msrb.mxu2 %v1148_v25 }
 0x879   :  { %516 = vmatpush.msrb.mxu2 %v1153_v26 }
 0x87b   :  { %517 = vmatpush.msrb.mxu2 %v1160_v27 }
 0x87d   :  { %518 = vmatpush.msrb.mxu2 %v1168_v28 }
 0x87f   :  { %519 = vmatpush.msrb.mxu2 %v1176_v29 }
 0x881   :  { %520 = vmatpush.msrb.mxu2 %v1184_v30 }
 0x883   :  { %521 = vmatpush.msrb.mxu2 %v1192_v31 }
 0x885   :  { %522 = vmatpush.msrb.mxu2 %v1200_v32 }
 0x887   :  { %523 = vmatpush.msrb.mxu2 %v1208_v33 }
 0x889   :  { %524 = vmatpush.msrb.mxu2 %v1216_v34 }
 0x88b   :  { %525 = vmatpush.msrb.mxu2 %v1224_v35 }
 0x88d   :  { %526 = vmatpush.msrb.mxu2 %v1232_v36 }
 0x88f   :  { %527 = vmatpush.msrb.mxu2 %v1240_v37 }
 0x891   :  { %528 = vmatpush.msrb.mxu2 %v1252_v42 }
 0x893   :  { %529 = vmatpush.msrb.mxu2 %v1259_v43 }
 0x895   :  { %530 = vmatpush.msrb.mxu2 %v1266_v44 }
 0x8f1   :  { %v381_v50 = vpop.f32.mrf.mxu2 }
 0x8f2   :  { %384 = vmax.xlane.f32.xlu0 %v381_v50 }
 0x965   :  { %v385_v51 = vpop.xlane.xlu0 %384 }
 0x966   :  { %vm386_vm12 = vcmp.eq.f32.partialorder %v381_v50, %v385_v51 }
 0x967   :  { %v387_v52 = vsel %vm386_vm12, %v1142_v20, 128 }
 0x968   :  { %v389_v53 = vshra.s32 %v387_v52, 16  ;;  %v388_v55 = vand.u32 65535, %v387_v52 }
 0x96a   :  { %v391_v54 = vcvt.s32.f32 %v389_v53  ;;  %v390_v57 = vcvt.s32.f32 %v388_v55 }
 0x96c   :  { %392 = vmin.xlane.f32.xlu1 %v391_v54 }
 0x9df   :  { %v393_v56 = vpop.xlane.xlu1 %392 }
 0x9e0   :  { %vm394_vm13 = vcmp.eq.f32.partialorder %v391_v54, %v393_v56  ;;  %v399_v59 = vcvt.f32.s32 %v393_v56 }
 0x9e1   :  { %v395_v58 = vsel %vm394_vm13, %v390_v57, inf }
 0x9e2   :  { %396 = vmin.xlane.f32.xlu2 %v395_v58  ;;  %v400_v62 = vshll.u32 %v399_v59, 16 }
 0xa55   :  { %v397_v61 = vpop.xlane.xlu2 %396 }
 0xa56   :  { %v398_v63 = vcvt.f32.s32 %v397_v61 }
 0xa58   :  { %v401_v0 = vadd.s32 %v400_v62, %v398_v63 }
 0xa5a   :  { %vm402_vm14 = vcmp.eq.s32.totalorder %v1142_v20, %v401_v0 }
 0xa5b   :  { %v999_v1 = vsel %vm402_vm14, 1.0, %v1038_v45  ;;  %1001 = vmatmul.msk.f32.vlgmr.msrb.gmra.mxu0 %vm402_vm14, %v1039_v60 }
 0xa5c   :  { %v838_v2 = vrot.slane %v999_v1, 1  ;;  %v839_v7 = vrot.slane %v999_v1, 2  ;;  %v840_v3 = vrot.slane %v999_v1, 3  ;;  %852 = vst [vmem:[%s1653_s3 + $0x3] sm:$0x1] %v999_v1  ;;  %728 = vmatpush.msrb.mxu0 %v1104_v10  ;;  %v841_v9 = vrot.slane %v999_v1, 4  ;;  %v424_v10 = vpop.f32.mrf.mxu2 }
 0xa5d   :  { %v842_v14 = vrot.slane %v999_v1, 5  ;;  %v843_v4 = vrot.slane %v999_v1, 6  ;;  %v844_v15 = vrot.slane %v999_v1, 7 }
 0xa5e   :  { %853 = vst [vmem:[%s1653_s3 + $0x13] sm:$0x1] %v838_v2  ;;  %729 = vmatpush.msrb.mxu0 %v1110_v11 }
 0xa5f   :  { %854 = vst [vmem:[%s1653_s3 + $0x23] sm:$0x1] %v839_v7 }
 0xa60   :  { %855 = vst [vmem:[%s1653_s3 + $0x33] sm:$0x1] %v840_v3  ;;  %730 = vmatpush.msrb.mxu0 %v1116_v12 }
 0xa61   :  { %856 = vst [vmem:[%s1653_s3 + $0x43] sm:$0x1] %v841_v9 }
 0xa62   :  { %857 = vst [vmem:[%s1653_s3 + $0x53] sm:$0x1] %v842_v14  ;;  %731 = vmatpush.msrb.mxu0 %v1123_v13 }
 0xa63   :  { %858 = vst [vmem:[%s1653_s3 + $0x63] sm:$0x1] %v843_v4 }
 0xa64   :  { %859 = vst [vmem:[%s1653_s3 + $0x73] sm:$0x1] %v844_v15 }
 0xad8   :  { %v444_v11 = vpop.f32.mrf.mxu0 }
 0xad9   :  { %v445_v12 = vadd.f32 %v444_v11, %v424_v10 }
 0xadb   :  { %v447_v5 = vadd.f32 %v1353_v8, %v445_v12 }
 0xadd   :  { %1030 = vtanh.f32 %v447_v5 }
 0xae3   :  { %v1031_v16 = vpop.eup %1030 }
 0xae4   :  { %1002 = vmatmul.msk.f32.vlgmr.msra.gmra.mxu2 %vm73_vm1, %v1031_v16  ;;  %1004 = vmatmul.msk.f32.vlgmr.msra.gmra.mxu3 %vm73_vm1, %v1031_v16 }
 0xae5   :  { %603 = vmatpush.msra.mxu3 %v1148_v25 }
 0xae7   :  { %604 = vmatpush.msra.mxu3 %v1153_v26 }
 0xae9   :  { %605 = vmatpush.msra.mxu3 %v1160_v27 }
 0xaeb   :  { %606 = vmatpush.msra.mxu3 %v1168_v28 }
 0xaed   :  { %607 = vmatpush.msra.mxu3 %v1176_v29 }
 0xaef   :  { %608 = vmatpush.msra.mxu3 %v1184_v30 }
 0xaf1   :  { %609 = vmatpush.msra.mxu3 %v1192_v31 }
 0xaf3   :  { %610 = vmatpush.msra.mxu3 %v1200_v32 }
 0xaf5   :  { %611 = vmatpush.msra.mxu3 %v1208_v33 }
 0xaf7   :  { %612 = vmatpush.msra.mxu3 %v1216_v34 }
 0xaf9   :  { %613 = vmatpush.msra.mxu3 %v1224_v35 }
 0xafb   :  { %614 = vmatpush.msra.mxu3 %v1232_v36 }
 0xafd   :  { %615 = vmatpush.msra.mxu3 %v1240_v37 }
 0xaff   :  { %616 = vmatpush.msra.mxu3 %v1252_v42 }
 0xb01   :  { %617 = vmatpush.msra.mxu3 %v1259_v43 }
 0xb03   :  { %618 = vmatpush.msra.mxu3 %v1266_v44 }
 0xb67   :  { %v469_v13 = vpop.f32.mrf.mxu2  ;;  %v512_v55 = vpop.f32.mrf.mxu3 }
 0xb68   :  { %472 = vmax.xlane.f32.xlu0 %v469_v13 }
 0xbdb   :  { %v473_v17 = vpop.xlane.xlu0 %472 }
 0xbdc   :  { %vm474_vm15 = vcmp.eq.f32.partialorder %v469_v13, %v473_v17 }
 0xbdd   :  { %v475_v18 = vsel %vm474_vm15, %v1142_v20, 128 }
 0xbde   :  { %v477_v6 = vshra.s32 %v475_v18, 16  ;;  %v476_v21 = vand.u32 65535, %v475_v18 }
 0xbe0   :  { %v479_v19 = vcvt.s32.f32 %v477_v6  ;;  %v478_v23 = vcvt.s32.f32 %v476_v21 }
 0xbe2   :  { %480 = vmin.xlane.f32.xlu1 %v479_v19 }
 0xc55   :  { %v481_v22 = vpop.xlane.xlu1 %480 }
 0xc56   :  { %vm482_vm0 = vcmp.eq.f32.partialorder %v479_v19, %v481_v22  ;;  %v487_v38 = vcvt.f32.s32 %v481_v22 }
 0xc57   :  { %v483_v24 = vsel %vm482_vm0, %v478_v23, inf }
 0xc58   :  { %484 = vmin.xlane.f32.xlu2 %v483_v24  ;;  %v488_v40 = vshll.u32 %v487_v38, 16 }
 0xccb   :  { %v485_v39 = vpop.xlane.xlu2 %484 }
 0xccc   :  { %v486_v41 = vcvt.f32.s32 %v485_v39 }
 0xcce   :  { %v489_v46 = vadd.s32 %v488_v40, %v486_v41 }
 0xcd0   :  { %vm490_vm2 = vcmp.eq.s32.totalorder %v1142_v20, %v489_v46 }
 0xcd1   :  { %v1003_v47 = vsel %vm490_vm2, 1.0, %v1038_v45  ;;  %1005 = vmatmul.msk.f32.vlgmr.msrb.gmra.mxu2 %vm490_vm2, %v1039_v60 }
 0xcd2   :  { %v862_v48 = vrot.slane %v1003_v47, 1  ;;  %v863_v49 = vrot.slane %v1003_v47, 2  ;;  %v864_v50 = vrot.slane %v1003_v47, 3  ;;  %876 = vst [vmem:[%s1653_s3 + $0x4] sm:$0x1] %v1003_v47  ;;  %v865_v51 = vrot.slane %v1003_v47, 4 }
 0xcd3   :  { %v866_v52 = vrot.slane %v1003_v47, 5  ;;  %v867_v53 = vrot.slane %v1003_v47, 6  ;;  %v868_v54 = vrot.slane %v1003_v47, 7 }
 0xcd4   :  { %877 = vst [vmem:[%s1653_s3 + $0x14] sm:$0x1] %v862_v48 }
 0xcd5   :  { %878 = vst [vmem:[%s1653_s3 + $0x24] sm:$0x1] %v863_v49 }
 0xcd6   :  { %879 = vst [vmem:[%s1653_s3 + $0x34] sm:$0x1] %v864_v50 }
 0xcd7   :  { %880 = vst [vmem:[%s1653_s3 + $0x44] sm:$0x1] %v865_v51 }
 0xcd8   :  { %881 = vst [vmem:[%s1653_s3 + $0x54] sm:$0x1] %v866_v52 }
 0xcd9   :  { %882 = vst [vmem:[%s1653_s3 + $0x64] sm:$0x1] %v867_v53 }
 0xcda   :  { %883 = vst [vmem:[%s1653_s3 + $0x74] sm:$0x1] %v868_v54 }
 0xd54   :  { %v532_v56 = vpop.f32.mrf.mxu2 }
 0xd55   :  { %v533_v57 = vadd.f32 %v532_v56, %v512_v55 }
 0xd57   :  { %v535_v58 = vadd.f32 %v1353_v8, %v533_v57 }
 0xd59   :  { %1032 = vtanh.f32 %v535_v58 }
 0xd5f   :  { %v1033_v59 = vpop.eup %1032 }
 0xd60   :  { %1006 = vmatmul.msk.f32.vlgmr.msrb.gmra.mxu3 %vm73_vm1, %v1033_v59  ;;  %1008 = vmatmul.msk.f32.vlgmr.msra.gmra.mxu1 %vm73_vm1, %v1033_v59 }
 0xd61   :  { %691 = vmatpush.msra.mxu1 %v1148_v25 }
 0xd63   :  { %692 = vmatpush.msra.mxu1 %v1153_v26 }
 0xd65   :  { %693 = vmatpush.msra.mxu1 %v1160_v27 }
 0xd67   :  { %694 = vmatpush.msra.mxu1 %v1168_v28 }
 0xd69   :  { %695 = vmatpush.msra.mxu1 %v1176_v29 }
 0xd6b   :  { %696 = vmatpush.msra.mxu1 %v1184_v30 }
 0xd6d   :  { %697 = vmatpush.msra.mxu1 %v1192_v31 }
 0xd6f   :  { %698 = vmatpush.msra.mxu1 %v1200_v32 }
 0xd71   :  { %699 = vmatpush.msra.mxu1 %v1208_v33 }
 0xd73   :  { %700 = vmatpush.msra.mxu1 %v1216_v34 }
 0xd75   :  { %701 = vmatpush.msra.mxu1 %v1224_v35 }
 0xd77   :  { %702 = vmatpush.msra.mxu1 %v1232_v36 }
 0xd79   :  { %703 = vmatpush.msra.mxu1 %v1240_v37 }
 0xd7b   :  { %704 = vmatpush.msra.mxu1 %v1252_v42 }
 0xd7d   :  { %705 = vmatpush.msra.mxu1 %v1259_v43 }
 0xd7f   :  { %706 = vmatpush.msra.mxu1 %v1266_v44 }
 0xddd   :  { %v600_v7 = vpop.f32.mrf.mxu1 }
 0xde3   :  { %v557_v25 = vpop.f32.mrf.mxu3 }
 0xde4   :  { %560 = vmax.xlane.f32.xlu0 %v557_v25 }
 0xe57   :  { %v561_v26 = vpop.xlane.xlu0 %560 }
 0xe58   :  { %vm562_vm3 = vcmp.eq.f32.partialorder %v557_v25, %v561_v26 }
 0xe59   :  { %v563_v27 = vsel %vm562_vm3, %v1142_v20, 128 }
 0xe5a   :  { %v565_v28 = vshra.s32 %v563_v27, 16  ;;  %v564_v30 = vand.u32 65535, %v563_v27 }
 0xe5c   :  { %v567_v29 = vcvt.s32.f32 %v565_v28  ;;  %v566_v32 = vcvt.s32.f32 %v564_v30 }
 0xe5e   :  { %568 = vmin.xlane.f32.xlu1 %v567_v29 }
 0xed1   :  { %v569_v31 = vpop.xlane.xlu1 %568 }
 0xed2   :  { %vm570_vm4 = vcmp.eq.f32.partialorder %v567_v29, %v569_v31  ;;  %v575_v34 = vcvt.f32.s32 %v569_v31 }
 0xed3   :  { %v571_v33 = vsel %vm570_vm4, %v566_v32, inf }
 0xed4   :  { %572 = vmin.xlane.f32.xlu2 %v571_v33  ;;  %v576_v36 = vshll.u32 %v575_v34, 16 }
 0xf47   :  { %v573_v35 = vpop.xlane.xlu2 %572 }
 0xf48   :  { %v574_v37 = vcvt.f32.s32 %v573_v35 }
 0xf4a   :  { %v577_v42 = vadd.s32 %v576_v36, %v574_v37 }
 0xf4c   :  { %vm578_vm5 = vcmp.eq.s32.totalorder %v1142_v20, %v577_v42 }
 0xf4d   :  { %v1007_v43 = vsel %vm578_vm5, 1.0, %v1038_v45  ;;  %1009 = vmatmul.msk.f32.vlgmr.msra.gmra.mxu3 %vm578_vm5, %v1039_v60 }
 0xf4e   :  { %v886_v44 = vrot.slane %v1007_v43, 1  ;;  %v887_v61 = vrot.slane %v1007_v43, 2  ;;  %v888_v62 = vrot.slane %v1007_v43, 3  ;;  %900 = vst [vmem:[%s1653_s3 + $0x5] sm:$0x1] %v1007_v43  ;;  %v889_v63 = vrot.slane %v1007_v43, 4 }
 0xf4f   :  { %v890_v0 = vrot.slane %v1007_v43, 5  ;;  %v891_v1 = vrot.slane %v1007_v43, 6  ;;  %v892_v2 = vrot.slane %v1007_v43, 7 }
 0xf50   :  { %901 = vst [vmem:[%s1653_s3 + $0x15] sm:$0x1] %v886_v44 }
 0xf51   :  { %902 = vst [vmem:[%s1653_s3 + $0x25] sm:$0x1] %v887_v61 }
 0xf52   :  { %903 = vst [vmem:[%s1653_s3 + $0x35] sm:$0x1] %v888_v62 }
 0xf53   :  { %904 = vst [vmem:[%s1653_s3 + $0x45] sm:$0x1] %v889_v63 }
 0xf54   :  { %905 = vst [vmem:[%s1653_s3 + $0x55] sm:$0x1] %v890_v0 }
 0xf55   :  { %906 = vst [vmem:[%s1653_s3 + $0x65] sm:$0x1] %v891_v1 }
 0xf56   :  { %907 = vst [vmem:[%s1653_s3 + $0x75] sm:$0x1] %v892_v2 }
 0xfd0   :  { %v620_v3 = vpop.f32.mrf.mxu3 }
 0xfd1   :  { %v621_v9 = vadd.f32 %v620_v3, %v600_v7 }
 0xfd3   :  { %v623_v14 = vadd.f32 %v1353_v8, %v621_v9 }
 0xfd5   :  { %1034 = vtanh.f32 %v623_v14 }
 0xfdb   :  { %v1035_v4 = vpop.eup %1034 }
 0xfdc   :  { %1010 = vmatmul.msk.f32.vlgmr.msrb.gmra.mxu1 %vm73_vm1, %v1035_v4  ;;  %1012 = vmatmul.msk.f32.vlgmr.msra.gmra.mxu0 %vm73_vm1, %v1035_v4 }
0x1059   :  { %v645_v15 = vpop.f32.mrf.mxu1 }
0x105a   :  { %648 = vmax.xlane.f32.xlu0 %v645_v15 }
0x10cd   :  { %v649_v10 = vpop.xlane.xlu0 %648 }
0x10ce   :  { %vm650_vm6 = vcmp.eq.f32.partialorder %v645_v15, %v649_v10 }
0x10cf   :  { %v651_v11 = vsel %vm650_vm6, %v1142_v20, 128 }
0x10d0   :  { %v653_v12 = vshra.s32 %v651_v11, 16  ;;  %v652_v16 = vand.u32 65535, %v651_v11 }
0x10d2   :  { %v655_v5 = vcvt.s32.f32 %v653_v12  ;;  %v654_v17 = vcvt.s32.f32 %v652_v16 }
0x10d4   :  { %656 = vmin.xlane.f32.xlu1 %v655_v5 }
0x1147   :  { %v657_v13 = vpop.xlane.xlu1 %656 }
0x1148   :  { %vm658_vm7 = vcmp.eq.f32.partialorder %v655_v5, %v657_v13  ;;  %v663_v6 = vcvt.f32.s32 %v657_v13 }
0x1149   :  { %v659_v18 = vsel %vm658_vm7, %v654_v17, inf }
0x114a   :  { %660 = vmin.xlane.f32.xlu2 %v659_v18  ;;  %v664_v21 = vshll.u32 %v663_v6, 16 }
0x11bd   :  { %v661_v19 = vpop.xlane.xlu2 %660 }
0x11be   :  { %v662_v22 = vcvt.f32.s32 %v661_v19 }
0x11c0   :  { %v665_v23 = vadd.s32 %v664_v21, %v662_v22 }
0x11c2   :  { %vm666_vm8 = vcmp.eq.s32.totalorder %v1142_v20, %v665_v23 }
0x11c3   :  { %v1011_v24 = vsel %vm666_vm8, 1.0, %v1038_v45  ;;  %1013 = vmatmul.msk.f32.vlgmr.msra.gmra.mxu1 %vm666_vm8, %v1039_v60  ;;  %v688_v60 = vpop.f32.mrf.mxu0 }
0x11c4   :  { %v910_v38 = vrot.slane %v1011_v24, 1  ;;  %v911_v39 = vrot.slane %v1011_v24, 2  ;;  %v912_v40 = vrot.slane %v1011_v24, 3  ;;  %924 = vst [vmem:[%s1653_s3 + $0x6] sm:$0x1] %v1011_v24  ;;  %v913_v41 = vrot.slane %v1011_v24, 4 }
0x11c5   :  { %v914_v46 = vrot.slane %v1011_v24, 5  ;;  %v915_v47 = vrot.slane %v1011_v24, 6  ;;  %v916_v48 = vrot.slane %v1011_v24, 7 }
0x11c6   :  { %925 = vst [vmem:[%s1653_s3 + $0x16] sm:$0x1] %v910_v38 }
0x11c7   :  { %926 = vst [vmem:[%s1653_s3 + $0x26] sm:$0x1] %v911_v39 }
0x11c8   :  { %927 = vst [vmem:[%s1653_s3 + $0x36] sm:$0x1] %v912_v40 }
0x11c9   :  { %928 = vst [vmem:[%s1653_s3 + $0x46] sm:$0x1] %v913_v41 }
0x11ca   :  { %929 = vst [vmem:[%s1653_s3 + $0x56] sm:$0x1] %v914_v46 }
0x11cb   :  { %930 = vst [vmem:[%s1653_s3 + $0x66] sm:$0x1] %v915_v47 }
0x11cc   :  { %931 = vst [vmem:[%s1653_s3 + $0x76] sm:$0x1] %v916_v48 }
0x1240   :  { %v708_v49 = vpop.f32.mrf.mxu1 }
0x1241   :  { %v709_v50 = vadd.f32 %v708_v49, %v688_v60 }
0x1243   :  { %v711_v51 = vadd.f32 %v1353_v8, %v709_v50 }
0x1245   :  { %1036 = vtanh.f32 %v711_v51 }
0x124b   :  { %v1037_v52 = vpop.eup %1036 }
0x124c   :  { %1014 = vmatmul.msk.f32.vlgmr.msrb.gmra.mxu0 %vm73_vm1, %v1037_v52 }
0x12c9   :  { %v733_v53 = vpop.f32.mrf.mxu0 }
0x12ca   :  { %736 = vmax.xlane.f32.xlu0 %v733_v53 }
0x133d   :  { %v737_v54 = vpop.xlane.xlu0 %736 }
0x133e   :  { %vm738_vm9 = vcmp.eq.f32.partialorder %v733_v53, %v737_v54 }
0x133f   :  { %v739_v55 = vsel %vm738_vm9, %v1142_v20, 128 }
0x1340   :  { %v741_v56 = vshra.s32 %v739_v55, 16  ;;  %v740_v58 = vand.u32 65535, %v739_v55 }
0x1342   :  { %v743_v57 = vcvt.s32.f32 %v741_v56  ;;  %v742_v25 = vcvt.s32.f32 %v740_v58 }
0x1344   :  { %744 = vmin.xlane.f32.xlu1 %v743_v57 }
0x13b7   :  { %v745_v59 = vpop.xlane.xlu1 %744 }
0x13b8   :  { %vm746_vm10 = vcmp.eq.f32.partialorder %v743_v57, %v745_v59  ;;  %v751_v8 = vcvt.f32.s32 %v745_v59 }
0x13b9   :  { %v747_v26 = vsel %vm746_vm10, %v742_v25, inf }
0x13ba   :  { %748 = vmin.xlane.f32.xlu2 %v747_v26  ;;  %v752_v28 = vshll.u32 %v751_v8, 16 }
0x142d   :  { %v749_v27 = vpop.xlane.xlu2 %748 }
0x142e   :  { %v750_v29 = vcvt.f32.s32 %v749_v27 }
0x1430   :  { %v753_v30 = vadd.s32 %v752_v28, %v750_v29 }
0x1432   :  { %vm754_vm1 = vcmp.eq.s32.totalorder %v1142_v20, %v753_v30 }
0x1433   :  { %v1015_v31 = vsel %vm754_vm1, 1.0, %v1038_v45 }
0x1434   :  { %v934_v32 = vrot.slane %v1015_v31, 1  ;;  %v935_v33 = vrot.slane %v1015_v31, 2  ;;  %v936_v34 = vrot.slane %v1015_v31, 3  ;;  %948 = vst [vmem:[%s1653_s3 + $0x7] sm:$0x1] %v1015_v31  ;;  %v937_v35 = vrot.slane %v1015_v31, 4 }
0x1435   :  { %v938_v36 = vrot.slane %v1015_v31, 5  ;;  %v939_v37 = vrot.slane %v1015_v31, 6  ;;  %v940_v20 = vrot.slane %v1015_v31, 7 }
0x1436   :  { %949 = vst [vmem:[%s1653_s3 + $0x17] sm:$0x1] %v934_v32 }
0x1437   :  { %950 = vst [vmem:[%s1653_s3 + $0x27] sm:$0x1] %v935_v33 }
0x1438   :  { %951 = vst [vmem:[%s1653_s3 + $0x37] sm:$0x1] %v936_v34 }
0x1439   :  { %952 = vst [vmem:[%s1653_s3 + $0x47] sm:$0x1] %v937_v35 }
0x143a   :  { %953 = vst [vmem:[%s1653_s3 + $0x57] sm:$0x1] %v938_v36 }
0x143b   :  { %954 = vst [vmem:[%s1653_s3 + $0x67] sm:$0x1] %v939_v37 }
0x143c   :  { %955 = vst [vmem:[%s1653_s3 + $0x77] sm:$0x1] %v940_v20 }

</bundles_post_ra>
